<compile_context>
chip_gen: v7x
topology: tpu7x:2x2x1
jax: 0.10.0
libtpu: 0.0.40
codegen_flags: <defaults>
</compile_context>

<pallas_src>
import functools
import math

import numpy as np
import jax
import jax.numpy as jnp
from jax.experimental import pallas as pl
from jax.experimental.pallas import tpu as pltpu


def _round_up(a, b):
    return -(-a // b) * b


# ---------------------------------------------------------------------------
# Deterministic parameter construction (faithful numpy port of the PyTorch
# module's __init__ helpers; no randomness, no checkpoint).
# ---------------------------------------------------------------------------
def gabor_square(sigma=5, theta=0.0, gamma=1, ksize=(5, 5), psi=1):
    sigma_x = sigma
    sigma_y = float(sigma) / gamma
    lambd = ksize[0] - 1
    xmax = int(ksize[0] / 2)
    xmax = np.ceil(max(1, xmax))
    ymax = int(ksize[1] / 2)
    ymax = np.ceil(max(1, ymax))
    xmin = -xmax
    ymin = -ymax
    x, y = np.meshgrid(np.arange(ymin, ymax + 1), np.arange(xmin, xmax + 1))
    x_theta = x * np.cos(theta) + y * np.sin(theta)
    y_theta = -x * np.sin(theta) + y * np.cos(theta)
    square_wave = np.zeros([ksize[0], ksize[1]])
    if psi == 0:
        for j in range(0, 30, 1):
            odd_n = 2 * j + 1
            omega = 2 * np.pi / lambd
            wave = 4 / math.pi * odd_n ** (-1) * np.cos(odd_n * omega * x_theta + j * math.pi)
            square_wave = square_wave + wave
    if psi == 1:
        for j in range(0, 30, 1):
            odd_n = 2 * j + 1
            omega = 2 * np.pi / lambd
            wave = -4 / math.pi * odd_n ** (-1) * np.cos(odd_n * omega * x_theta + math.pi / 2)
            square_wave = square_wave + wave
    gb_square_wave = np.exp(
        -0.5 * (x_theta ** 2 / sigma_x ** 2 + y_theta ** 2 / sigma_y ** 2)) * square_wave
    return gb_square_wave


def get_weight(in_channels=3, kernel_size=(5, 5), sigma=5, psi=0):
    rotation_step = math.pi / 12
    theta_lst = [i * rotation_step for i in range(12)]
    kernels = []
    for t in theta_lst:
        k = gabor_square(sigma, theta=t, ksize=kernel_size, psi=psi).astype(np.float32)
        kernels.append(k)
    weight = np.stack(kernels, axis=0)                              # (12, KH, KW)
    weight = np.repeat(weight[:, None, :, :], in_channels, axis=1)  # (12, C, KH, KW)
    return weight.astype(np.float32)


def build_fused_gabor_bank(in_channels, kernel_size=(5, 5), sigma=5):
    """Fused even+odd bank (x*We + x*Wo == x*(We+Wo)), tap-major flat columns.

    Built once in numpy at module-construction time -> a ~4.8 KB constant, no
    per-call XLA ops for the add/transpose/reshape.
    """
    KH, KW = kernel_size
    w_even = get_weight(in_channels, kernel_size, sigma, psi=0)
    w_odd = get_weight(in_channels, kernel_size, sigma, psi=1)
    w_comb = w_even + w_odd                                         # (12, C, KH, KW)
    w_flat = np.transpose(w_comb, (0, 2, 3, 1)).reshape(12, KH * KW * in_channels)
    return np.ascontiguousarray(w_flat.astype(np.float32))


# ---------------------------------------------------------------------------
# Pallas kernel: in-kernel im2col (body + halo stitch) + one MXU matmul / tile.
# ---------------------------------------------------------------------------
def _gabor_conv_kernel(x_ref, h_ref, w_ref, o_ref, p_ref, *, tap_offsets, n_ch, tile):
    # x_ref: (1, C, tile)      body window of the padded, row-flattened input
    # h_ref: (1, C, halo_p)    halo window starting right after the body (next tile's head)
    # w_ref: (COUT, C*KH*KW)   fused even+odd Gabor bank (tap-major columns)
    # o_ref: (1, COUT, tile)   lane-dense output tile (flat spatial on lanes)
    # p_ref: (C*KH*KW, tile)   VMEM scratch: im2col patch matrix
    for t, s in enumerate(tap_offsets):          # static Python loop over taps
        rows = slice(t * n_ch, (t + 1) * n_ch)
        n_body = tile - s
        if n_body > 0:
            p_ref[rows, :n_body] = x_ref[0, :, s:]
        if s > 0:
            p_ref[rows, n_body:] = h_ref[0, :, :s]
    o_ref[0] = jnp.dot(w_ref[...], p_ref[...],
                       preferred_element_type=jnp.float32).astype(o_ref.dtype)


def gabor_square_forward(x, w_flat, kernel_size=(5, 5)):
    """x: (B, C, H, W) f32; w_flat: (COUT, C*KH*KW) fused bank -> (B, COUT, H_out, W_out)."""
    B, C, H, W = x.shape
    KH, KW = kernel_size
    COUT = w_flat.shape[0]
    ck = C * KH * KW

    pad = KH // 2                                 # F.conv2d pads both dims by KH//2
    Hp, Wp = H + 2 * pad, W + 2 * pad
    H_out, W_out = Hp - KH + 1, Wp - KW + 1

    # Flat outputs are computed on the padded row stride: q = h*Wp + w.
    n_out = H_out * Wp
    halo = (KH - 1) * Wp + (KW - 1)               # max tap offset
    halo_p = _round_up(halo, 128)                 # lane-aligned halo block

    # Tile the flat spatial axis: a multiple of halo_p (so the halo block lands on
    # a block boundary), large enough to amortize ~0.35us/step grid overhead and
    # keep halo read amplification <= ~25%, small enough that the im2col scratch
    # stays well inside VMEM on every generation (v7x: 64 MiB physical).
    work = _round_up(n_out, halo_p)
    target = _round_up(max(8192, 4 * halo_p), halo_p)
    vmem_cap = max(halo_p, ((12 << 20) // (ck * 4)) // halo_p * halo_p)
    tile = max(halo_p, min(target, vmem_cap, work))
    n_tiles = -(-n_out // tile)
    if B == 1 and n_tiles == 1 and work >= 2 * halo_p:
        # keep >= 2 grid programs so both v7x TensorCores get work
        tile = _round_up(work // 2, halo_p)
        n_tiles = -(-n_out // tile)
    n_pad = n_tiles * tile

    # Single zero-pad: spatial halo + enough extra bottom rows so the flattened
    # length covers the last tile plus its halo block (one HBM pass, not two).
    # TODO(synk): zero-filling borders inside the kernel would remove this pass too.
    needed = n_pad + halo_p
    extra_rows = max(0, -(-(needed - Hp * Wp) // Wp))
    xp = jnp.pad(x, ((0, 0), (0, 0), (pad, pad + extra_rows), (pad, pad)))
    xflat = xp.reshape(B, C, -1)                  # (B, C, >= n_pad + halo_p)

    tap_offsets = tuple(kh * Wp + kw for kh in range(KH) for kw in range(KW))
    bpt = tile // halo_p                          # halo blocks per tile (exact)

    kernel = functools.partial(_gabor_conv_kernel,
                               tap_offsets=tap_offsets, n_ch=C, tile=tile)

    out_flat = pl.pallas_call(
        kernel,
        out_shape=jax.ShapeDtypeStruct((B, COUT, n_pad), x.dtype),
        grid=(B, n_tiles),
        in_specs=[
            pl.BlockSpec((1, C, tile), lambda b, j: (b, 0, j)),               # body
            pl.BlockSpec((1, C, halo_p), lambda b, j: (b, 0, (j + 1) * bpt)), # halo
            pl.BlockSpec((COUT, ck), lambda b, j: (0, 0)),                    # weights
        ],
        out_specs=pl.BlockSpec((1, COUT, tile), lambda b, j: (b, 0, j)),
        scratch_shapes=[pltpu.VMEM((ck, tile), jnp.float32)],
        compiler_params=pltpu.CompilerParams(
            dimension_semantics=("parallel", "parallel"),
            vmem_limit_bytes=48 << 20),
    )(xflat, xflat, w_flat)

    # The one remaining output-sized glue pass: crop the padded-row-stride flat
    # output back to dense NCHW.  (Repacking in-kernel would reintroduce masked
    # lane stores whenever W_out is not a multiple of 128.)
    out = out_flat[:, :, :n_out].reshape(B, COUT, H_out, Wp)[:, :, :, :W_out]
    return out


# ---------------------------------------------------------------------------
# Reference (pure JAX, original unfused even/odd banks) for verification.
# ---------------------------------------------------------------------------
def _reference(x, kernel_size, sigma, in_channels):
    pad = kernel_size[0] // 2
    w_even = jnp.asarray(get_weight(in_channels, kernel_size, sigma, psi=0))
    w_odd = jnp.asarray(get_weight(in_channels, kernel_size, sigma, psi=1))
    dn = ("NCHW", "OIHW", "NCHW")
    kwargs = dict(window_strides=(1, 1), padding=((pad, pad), (pad, pad)),
                  dimension_numbers=dn, precision=jax.lax.Precision.HIGHEST)
    even = jax.lax.conv_general_dilated(x, w_even, **kwargs)
    odd = jax.lax.conv_general_dilated(x, w_odd, **kwargs)
    return even + odd


if __name__ == "__main__":
    B, C, H, W = 2, 4, 16, 16
    kernel_size = (5, 5)
    sigma = 5

    # Deterministic parameters (module __init__): fused bank baked as a constant.
    w_flat = build_fused_gabor_bank(C, kernel_size, sigma)

    key = jax.random.PRNGKey(0)
    x = jax.random.normal(key, (B, C, H, W), dtype=jnp.float32)

    fwd = jax.jit(gabor_square_forward, static_argnums=(2,))
    out = jax.block_until_ready(fwd(x, w_flat, kernel_size))

    assert out.shape == (B, 12, H, W), out.shape

    ref = jax.block_until_ready(_reference(x, kernel_size, sigma, C))
    np.testing.assert_allclose(np.asarray(out), np.asarray(ref), rtol=1e-3, atol=1e-3)

    print("KERNEL_OK")
</pallas_src>

<mosaic_0001>
module attributes {stable_mosaic.version = 11 : i64} {
  func.func @_gabor_conv_kernel(%arg0: i32, %arg1: i32, %arg2: memref<1x4x384xf32, #tpu.memory_space<vmem>>, %arg3: memref<1x4x128xf32, #tpu.memory_space<vmem>>, %arg4: memref<12x100xf32, #tpu.memory_space<vmem>>, %arg5: memref<1x12x384xf32, #tpu.memory_space<vmem>>, %arg6: memref<100x384xf32, #tpu.memory_space<vmem>>) attributes {dimension_semantics = [#tpu.dimension_semantics<parallel>, #tpu.dimension_semantics<parallel>], iteration_bounds = array<i64: 2, 1>, scalar_prefetch = 0 : i64, scratch_operands = 1 : i64, tpu.core_type = #tpu.core_type<tc>, window_params = [{transform_indices = @transform_0, window_bounds = array<i64: 1, 4, 384>}, {transform_indices = @transform_1, window_bounds = array<i64: 1, 4, 128>}, {pipeline_mode = #tpu.pipeline_mode<synchronous>, transform_indices = @transform_2, window_bounds = array<i64: 12, 100>}, {transform_indices = @transform_3, window_bounds = array<i64: 1, 12, 384>}]} {
    %c0 = arith.constant 0 : index
    %c0_0 = arith.constant 0 : index
    %c0_1 = arith.constant 0 : index
    %0 = vector.load %arg2[%c0, %c0_0, %c0_1] : memref<1x4x384xf32, #tpu.memory_space<vmem>>, vector<1x4x384xf32>
    %1 = vector.shape_cast %0 : vector<1x4x384xf32> to vector<4x384xf32>
    %c0_2 = arith.constant 0 : index
    %c0_3 = arith.constant 0 : index
    %2 = vector.load %arg6[%c0_2, %c0_3] : memref<100x384xf32, #tpu.memory_space<vmem>>, vector<4x384xf32>
    tpu.vector_store %arg6[%c0_2, %c0_3], %1 {strides = array<i32>} : memref<100x384xf32, #tpu.memory_space<vmem>>, vector<4x384xf32>,
    %c0_4 = arith.constant 0 : index
    %c0_5 = arith.constant 0 : index
    %c1 = arith.constant 1 : index
    %3 = vector.load %arg2[%c0_4, %c0_5, %c1] : memref<1x4x384xf32, #tpu.memory_space<vmem>>, vector<1x4x383xf32>
    %4 = vector.shape_cast %3 : vector<1x4x383xf32> to vector<4x383xf32>
    %c4 = arith.constant 4 : index
    %c0_6 = arith.constant 0 : index
    %5 = vector.load %arg6[%c4, %c0_6] : memref<100x384xf32, #tpu.memory_space<vmem>>, vector<4x383xf32>
    tpu.vector_store %arg6[%c4, %c0_6], %4 {strides = array<i32>} : memref<100x384xf32, #tpu.memory_space<vmem>>, vector<4x383xf32>,
    %c0_7 = arith.constant 0 : index
    %c0_8 = arith.constant 0 : index
    %c0_9 = arith.constant 0 : index
    %6 = vector.load %arg3[%c0_7, %c0_8, %c0_9] : memref<1x4x128xf32, #tpu.memory_space<vmem>>, vector<1x4x1xf32>
    %7 = vector.shape_cast %6 : vector<1x4x1xf32> to vector<4x1xf32>
    %c4_10 = arith.constant 4 : index
    %c383 = arith.constant 383 : index
    %8 = vector.load %arg6[%c4_10, %c383] : memref<100x384xf32, #tpu.memory_space<vmem>>, vector<4x1xf32>
    tpu.vector_store %arg6[%c4_10, %c383], %7 {strides = array<i32>} : memref<100x384xf32, #tpu.memory_space<vmem>>, vector<4x1xf32>,
    %c0_11 = arith.constant 0 : index
    %c0_12 = arith.constant 0 : index
    %c2 = arith.constant 2 : index
    %9 = vector.load %arg2[%c0_11, %c0_12, %c2] : memref<1x4x384xf32, #tpu.memory_space<vmem>>, vector<1x4x382xf32>
    %10 = vector.shape_cast %9 : vector<1x4x382xf32> to vector<4x382xf32>
    %c8 = arith.constant 8 : index
    %c0_13 = arith.constant 0 : index
    %11 = vector.load %arg6[%c8, %c0_13] : memref<100x384xf32, #tpu.memory_space<vmem>>, vector<4x382xf32>
    tpu.vector_store %arg6[%c8, %c0_13], %10 {strides = array<i32>} : memref<100x384xf32, #tpu.memory_space<vmem>>, vector<4x382xf32>,
    %c0_14 = arith.constant 0 : index
    %c0_15 = arith.constant 0 : index
    %c0_16 = arith.constant 0 : index
    %12 = vector.load %arg3[%c0_14, %c0_15, %c0_16] : memref<1x4x128xf32, #tpu.memory_space<vmem>>, vector<1x4x2xf32>
    %13 = vector.shape_cast %12 : vector<1x4x2xf32> to vector<4x2xf32>
    %c8_17 = arith.constant 8 : index
    %c382 = arith.constant 382 : index
    %14 = vector.load %arg6[%c8_17, %c382] : memref<100x384xf32, #tpu.memory_space<vmem>>, vector<4x2xf32>
    tpu.vector_store %arg6[%c8_17, %c382], %13 {strides = array<i32>} : memref<100x384xf32, #tpu.memory_space<vmem>>, vector<4x2xf32>,
    %c0_18 = arith.constant 0 : index
    %c0_19 = arith.constant 0 : index
    %c3 = arith.constant 3 : index
    %15 = vector.load %arg2[%c0_18, %c0_19, %c3] : memref<1x4x384xf32, #tpu.memory_space<vmem>>, vector<1x4x381xf32>
    %16 = vector.shape_cast %15 : vector<1x4x381xf32> to vector<4x381xf32>
    %c12 = arith.constant 12 : index
    %c0_20 = arith.constant 0 : index
    %17 = vector.load %arg6[%c12, %c0_20] : memref<100x384xf32, #tpu.memory_space<vmem>>, vector<4x381xf32>
    tpu.vector_store %arg6[%c12, %c0_20], %16 {strides = array<i32>} : memref<100x384xf32, #tpu.memory_space<vmem>>, vector<4x381xf32>,
    %c0_21 = arith.constant 0 : index
    %c0_22 = arith.constant 0 : index
    %c0_23 = arith.constant 0 : index
    %18 = vector.load %arg3[%c0_21, %c0_22, %c0_23] : memref<1x4x128xf32, #tpu.memory_space<vmem>>, vector<1x4x3xf32>
    %19 = vector.shape_cast %18 : vector<1x4x3xf32> to vector<4x3xf32>
    %c12_24 = arith.constant 12 : index
    %c381 = arith.constant 381 : index
    %20 = vector.load %arg6[%c12_24, %c381] : memref<100x384xf32, #tpu.memory_space<vmem>>, vector<4x3xf32>
    tpu.vector_store %arg6[%c12_24, %c381], %19 {strides = array<i32>} : memref<100x384xf32, #tpu.memory_space<vmem>>, vector<4x3xf32>,
    %c0_25 = arith.constant 0 : index
    %c0_26 = arith.constant 0 : index
    %c4_27 = arith.constant 4 : index
    %21 = vector.load %arg2[%c0_25, %c0_26, %c4_27] : memref<1x4x384xf32, #tpu.memory_space<vmem>>, vector<1x4x380xf32>
    %22 = vector.shape_cast %21 : vector<1x4x380xf32> to vector<4x380xf32>
    %c16 = arith.constant 16 : index
    %c0_28 = arith.constant 0 : index
    %23 = vector.load %arg6[%c16, %c0_28] : memref<100x384xf32, #tpu.memory_space<vmem>>, vector<4x380xf32>
    tpu.vector_store %arg6[%c16, %c0_28], %22 {strides = array<i32>} : memref<100x384xf32, #tpu.memory_space<vmem>>, vector<4x380xf32>,
    %c0_29 = arith.constant 0 : index
    %c0_30 = arith.constant 0 : index
    %c0_31 = arith.constant 0 : index
    %24 = vector.load %arg3[%c0_29, %c0_30, %c0_31] : memref<1x4x128xf32, #tpu.memory_space<vmem>>, vector<1x4x4xf32>
    %25 = vector.shape_cast %24 : vector<1x4x4xf32> to vector<4x4xf32>
    %c16_32 = arith.constant 16 : index
    %c380 = arith.constant 380 : index
    %26 = vector.load %arg6[%c16_32, %c380] : memref<100x384xf32, #tpu.memory_space<vmem>>, vector<4x4xf32>
    tpu.vector_store %arg6[%c16_32, %c380], %25 {strides = array<i32>} : memref<100x384xf32, #tpu.memory_space<vmem>>, vector<4x4xf32>,
    %c0_33 = arith.constant 0 : index
    %c0_34 = arith.constant 0 : index
    %c20 = arith.constant 20 : index
    %27 = vector.load %arg2[%c0_33, %c0_34, %c20] : memref<1x4x384xf32, #tpu.memory_space<vmem>>, vector<1x4x364xf32>
    %28 = vector.shape_cast %27 : vector<1x4x364xf32> to vector<4x364xf32>
    %c20_35 = arith.constant 20 : index
    %c0_36 = arith.constant 0 : index
    %29 = vector.load %arg6[%c20_35, %c0_36] : memref<100x384xf32, #tpu.memory_space<vmem>>, vector<4x364xf32>
    tpu.vector_store %arg6[%c20_35, %c0_36], %28 {strides = array<i32>} : memref<100x384xf32, #tpu.memory_space<vmem>>, vector<4x364xf32>,
    %c0_37 = arith.constant 0 : index
    %c0_38 = arith.constant 0 : index
    %c0_39 = arith.constant 0 : index
    %30 = vector.load %arg3[%c0_37, %c0_38, %c0_39] : memref<1x4x128xf32, #tpu.memory_space<vmem>>, vector<1x4x20xf32>
    %31 = vector.shape_cast %30 : vector<1x4x20xf32> to vector<4x20xf32>
    %c20_40 = arith.constant 20 : index
    %c364 = arith.constant 364 : index
    %32 = vector.load %arg6[%c20_40, %c364] : memref<100x384xf32, #tpu.memory_space<vmem>>, vector<4x20xf32>
    tpu.vector_store %arg6[%c20_40, %c364], %31 {strides = array<i32>} : memref<100x384xf32, #tpu.memory_space<vmem>>, vector<4x20xf32>,
    %c0_41 = arith.constant 0 : index
    %c0_42 = arith.constant 0 : index
    %c21 = arith.constant 21 : index
    %33 = vector.load %arg2[%c0_41, %c0_42, %c21] : memref<1x4x384xf32, #tpu.memory_space<vmem>>, vector<1x4x363xf32>
    %34 = vector.shape_cast %33 : vector<1x4x363xf32> to vector<4x363xf32>
    %c24 = arith.constant 24 : index
    %c0_43 = arith.constant 0 : index
    %35 = vector.load %arg6[%c24, %c0_43] : memref<100x384xf32, #tpu.memory_space<vmem>>, vector<4x363xf32>
    tpu.vector_store %arg6[%c24, %c0_43], %34 {strides = array<i32>} : memref<100x384xf32, #tpu.memory_space<vmem>>, vector<4x363xf32>,
    %c0_44 = arith.constant 0 : index
    %c0_45 = arith.constant 0 : index
    %c0_46 = arith.constant 0 : index
    %36 = vector.load %arg3[%c0_44, %c0_45, %c0_46] : memref<1x4x128xf32, #tpu.memory_space<vmem>>, vector<1x4x21xf32>
    %37 = vector.shape_cast %36 : vector<1x4x21xf32> to vector<4x21xf32>
    %c24_47 = arith.constant 24 : index
    %c363 = arith.constant 363 : index
    %38 = vector.load %arg6[%c24_47, %c363] : memref<100x384xf32, #tpu.memory_space<vmem>>, vector<4x21xf32>
    tpu.vector_store %arg6[%c24_47, %c363], %37 {strides = array<i32>} : memref<100x384xf32, #tpu.memory_space<vmem>>, vector<4x21xf32>,
    %c0_48 = arith.constant 0 : index
    %c0_49 = arith.constant 0 : index
    %c22 = arith.constant 22 : index
    %39 = vector.load %arg2[%c0_48, %c0_49, %c22] : memref<1x4x384xf32, #tpu.memory_space<vmem>>, vector<1x4x362xf32>
    %40 = vector.shape_cast %39 : vector<1x4x362xf32> to vector<4x362xf32>
    %c28 = arith.constant 28 : index
    %c0_50 = arith.constant 0 : index
    %41 = vector.load %arg6[%c28, %c0_50] : memref<100x384xf32, #tpu.memory_space<vmem>>, vector<4x362xf32>
    tpu.vector_store %arg6[%c28, %c0_50], %40 {strides = array<i32>} : memref<100x384xf32, #tpu.memory_space<vmem>>, vector<4x362xf32>,
    %c0_51 = arith.constant 0 : index
    %c0_52 = arith.constant 0 : index
    %c0_53 = arith.constant 0 : index
    %42 = vector.load %arg3[%c0_51, %c0_52, %c0_53] : memref<1x4x128xf32, #tpu.memory_space<vmem>>, vector<1x4x22xf32>
    %43 = vector.shape_cast %42 : vector<1x4x22xf32> to vector<4x22xf32>
    %c28_54 = arith.constant 28 : index
    %c362 = arith.constant 362 : index
    %44 = vector.load %arg6[%c28_54, %c362] : memref<100x384xf32, #tpu.memory_space<vmem>>, vector<4x22xf32>
    tpu.vector_store %arg6[%c28_54, %c362], %43 {strides = array<i32>} : memref<100x384xf32, #tpu.memory_space<vmem>>, vector<4x22xf32>,
    %c0_55 = arith.constant 0 : index
    %c0_56 = arith.constant 0 : index
    %c23 = arith.constant 23 : index
    %45 = vector.load %arg2[%c0_55, %c0_56, %c23] : memref<1x4x384xf32, #tpu.memory_space<vmem>>, vector<1x4x361xf32>
    %46 = vector.shape_cast %45 : vector<1x4x361xf32> to vector<4x361xf32>
    %c32 = arith.constant 32 : index
    %c0_57 = arith.constant 0 : index
    %47 = vector.load %arg6[%c32, %c0_57] : memref<100x384xf32, #tpu.memory_space<vmem>>, vector<4x361xf32>
    tpu.vector_store %arg6[%c32, %c0_57], %46 {strides = array<i32>} : memref<100x384xf32, #tpu.memory_space<vmem>>, vector<4x361xf32>,
    %c0_58 = arith.constant 0 : index
    %c0_59 = arith.constant 0 : index
    %c0_60 = arith.constant 0 : index
    %48 = vector.load %arg3[%c0_58, %c0_59, %c0_60] : memref<1x4x128xf32, #tpu.memory_space<vmem>>, vector<1x4x23xf32>
    %49 = vector.shape_cast %48 : vector<1x4x23xf32> to vector<4x23xf32>
    %c32_61 = arith.constant 32 : index
    %c361 = arith.constant 361 : index
    %50 = vector.load %arg6[%c32_61, %c361] : memref<100x384xf32, #tpu.memory_space<vmem>>, vector<4x23xf32>
    tpu.vector_store %arg6[%c32_61, %c361], %49 {strides = array<i32>} : memref<100x384xf32, #tpu.memory_space<vmem>>, vector<4x23xf32>,
    %c0_62 = arith.constant 0 : index
    %c0_63 = arith.constant 0 : index
    %c24_64 = arith.constant 24 : index
    %51 = vector.load %arg2[%c0_62, %c0_63, %c24_64] : memref<1x4x384xf32, #tpu.memory_space<vmem>>, vector<1x4x360xf32>
    %52 = vector.shape_cast %51 : vector<1x4x360xf32> to vector<4x360xf32>
    %c36 = arith.constant 36 : index
    %c0_65 = arith.constant 0 : index
    %53 = vector.load %arg6[%c36, %c0_65] : memref<100x384xf32, #tpu.memory_space<vmem>>, vector<4x360xf32>
    tpu.vector_store %arg6[%c36, %c0_65], %52 {strides = array<i32>} : memref<100x384xf32, #tpu.memory_space<vmem>>, vector<4x360xf32>,
    %c0_66 = arith.constant 0 : index
    %c0_67 = arith.constant 0 : index
    %c0_68 = arith.constant 0 : index
    %54 = vector.load %arg3[%c0_66, %c0_67, %c0_68] : memref<1x4x128xf32, #tpu.memory_space<vmem>>, vector<1x4x24xf32>
    %55 = vector.shape_cast %54 : vector<1x4x24xf32> to vector<4x24xf32>
    %c36_69 = arith.constant 36 : index
    %c360 = arith.constant 360 : index
    %56 = vector.load %arg6[%c36_69, %c360] : memref<100x384xf32, #tpu.memory_space<vmem>>, vector<4x24xf32>
    tpu.vector_store %arg6[%c36_69, %c360], %55 {strides = array<i32>} : memref<100x384xf32, #tpu.memory_space<vmem>>, vector<4x24xf32>,
    %c0_70 = arith.constant 0 : index
    %c0_71 = arith.constant 0 : index
    %c40 = arith.constant 40 : index
    %57 = vector.load %arg2[%c0_70, %c0_71, %c40] : memref<1x4x384xf32, #tpu.memory_space<vmem>>, vector<1x4x344xf32>
    %58 = vector.shape_cast %57 : vector<1x4x344xf32> to vector<4x344xf32>
    %c40_72 = arith.constant 40 : index
    %c0_73 = arith.constant 0 : index
    %59 = vector.load %arg6[%c40_72, %c0_73] : memref<100x384xf32, #tpu.memory_space<vmem>>, vector<4x344xf32>
    tpu.vector_store %arg6[%c40_72, %c0_73], %58 {strides = array<i32>} : memref<100x384xf32, #tpu.memory_space<vmem>>, vector<4x344xf32>,
    %c0_74 = arith.constant 0 : index
    %c0_75 = arith.constant 0 : index
    %c0_76 = arith.constant 0 : index
    %60 = vector.load %arg3[%c0_74, %c0_75, %c0_76] : memref<1x4x128xf32, #tpu.memory_space<vmem>>, vector<1x4x40xf32>
    %61 = vector.shape_cast %60 : vector<1x4x40xf32> to vector<4x40xf32>
    %c40_77 = arith.constant 40 : index
    %c344 = arith.constant 344 : index
    %62 = vector.load %arg6[%c40_77, %c344] : memref<100x384xf32, #tpu.memory_space<vmem>>, vector<4x40xf32>
    tpu.vector_store %arg6[%c40_77, %c344], %61 {strides = array<i32>} : memref<100x384xf32, #tpu.memory_space<vmem>>, vector<4x40xf32>,
    %c0_78 = arith.constant 0 : index
    %c0_79 = arith.constant 0 : index
    %c41 = arith.constant 41 : index
    %63 = vector.load %arg2[%c0_78, %c0_79, %c41] : memref<1x4x384xf32, #tpu.memory_space<vmem>>, vector<1x4x343xf32>
    %64 = vector.shape_cast %63 : vector<1x4x343xf32> to vector<4x343xf32>
    %c44 = arith.constant 44 : index
    %c0_80 = arith.constant 0 : index
    %65 = vector.load %arg6[%c44, %c0_80] : memref<100x384xf32, #tpu.memory_space<vmem>>, vector<4x343xf32>
    tpu.vector_store %arg6[%c44, %c0_80], %64 {strides = array<i32>} : memref<100x384xf32, #tpu.memory_space<vmem>>, vector<4x343xf32>,
    %c0_81 = arith.constant 0 : index
    %c0_82 = arith.constant 0 : index
    %c0_83 = arith.constant 0 : index
    %66 = vector.load %arg3[%c0_81, %c0_82, %c0_83] : memref<1x4x128xf32, #tpu.memory_space<vmem>>, vector<1x4x41xf32>
    %67 = vector.shape_cast %66 : vector<1x4x41xf32> to vector<4x41xf32>
    %c44_84 = arith.constant 44 : index
    %c343 = arith.constant 343 : index
    %68 = vector.load %arg6[%c44_84, %c343] : memref<100x384xf32, #tpu.memory_space<vmem>>, vector<4x41xf32>
    tpu.vector_store %arg6[%c44_84, %c343], %67 {strides = array<i32>} : memref<100x384xf32, #tpu.memory_space<vmem>>, vector<4x41xf32>,
    %c0_85 = arith.constant 0 : index
    %c0_86 = arith.constant 0 : index
    %c42 = arith.constant 42 : index
    %69 = vector.load %arg2[%c0_85, %c0_86, %c42] : memref<1x4x384xf32, #tpu.memory_space<vmem>>, vector<1x4x342xf32>
    %70 = vector.shape_cast %69 : vector<1x4x342xf32> to vector<4x342xf32>
    %c48 = arith.constant 48 : index
    %c0_87 = arith.constant 0 : index
    %71 = vector.load %arg6[%c48, %c0_87] : memref<100x384xf32, #tpu.memory_space<vmem>>, vector<4x342xf32>
    tpu.vector_store %arg6[%c48, %c0_87], %70 {strides = array<i32>} : memref<100x384xf32, #tpu.memory_space<vmem>>, vector<4x342xf32>,
    %c0_88 = arith.constant 0 : index
    %c0_89 = arith.constant 0 : index
    %c0_90 = arith.constant 0 : index
    %72 = vector.load %arg3[%c0_88, %c0_89, %c0_90] : memref<1x4x128xf32, #tpu.memory_space<vmem>>, vector<1x4x42xf32>
    %73 = vector.shape_cast %72 : vector<1x4x42xf32> to vector<4x42xf32>
    %c48_91 = arith.constant 48 : index
    %c342 = arith.constant 342 : index
    %74 = vector.load %arg6[%c48_91, %c342] : memref<100x384xf32, #tpu.memory_space<vmem>>, vector<4x42xf32>
    tpu.vector_store %arg6[%c48_91, %c342], %73 {strides = array<i32>} : memref<100x384xf32, #tpu.memory_space<vmem>>, vector<4x42xf32>,
    %c0_92 = arith.constant 0 : index
    %c0_93 = arith.constant 0 : index
    %c43 = arith.constant 43 : index
    %75 = vector.load %arg2[%c0_92, %c0_93, %c43] : memref<1x4x384xf32, #tpu.memory_space<vmem>>, vector<1x4x341xf32>
    %76 = vector.shape_cast %75 : vector<1x4x341xf32> to vector<4x341xf32>
    %c52 = arith.constant 52 : index
    %c0_94 = arith.constant 0 : index
    %77 = vector.load %arg6[%c52, %c0_94] : memref<100x384xf32, #tpu.memory_space<vmem>>, vector<4x341xf32>
    tpu.vector_store %arg6[%c52, %c0_94], %76 {strides = array<i32>} : memref<100x384xf32, #tpu.memory_space<vmem>>, vector<4x341xf32>,
    %c0_95 = arith.constant 0 : index
    %c0_96 = arith.constant 0 : index
    %c0_97 = arith.constant 0 : index
    %78 = vector.load %arg3[%c0_95, %c0_96, %c0_97] : memref<1x4x128xf32, #tpu.memory_space<vmem>>, vector<1x4x43xf32>
    %79 = vector.shape_cast %78 : vector<1x4x43xf32> to vector<4x43xf32>
    %c52_98 = arith.constant 52 : index
    %c341 = arith.constant 341 : index
    %80 = vector.load %arg6[%c52_98, %c341] : memref<100x384xf32, #tpu.memory_space<vmem>>, vector<4x43xf32>
    tpu.vector_store %arg6[%c52_98, %c341], %79 {strides = array<i32>} : memref<100x384xf32, #tpu.memory_space<vmem>>, vector<4x43xf32>,
    %c0_99 = arith.constant 0 : index
    %c0_100 = arith.constant 0 : index
    %c44_101 = arith.constant 44 : index
    %81 = vector.load %arg2[%c0_99, %c0_100, %c44_101] : memref<1x4x384xf32, #tpu.memory_space<vmem>>, vector<1x4x340xf32>
    %82 = vector.shape_cast %81 : vector<1x4x340xf32> to vector<4x340xf32>
    %c56 = arith.constant 56 : index
    %c0_102 = arith.constant 0 : index
    %83 = vector.load %arg6[%c56, %c0_102] : memref<100x384xf32, #tpu.memory_space<vmem>>, vector<4x340xf32>
    tpu.vector_store %arg6[%c56, %c0_102], %82 {strides = array<i32>} : memref<100x384xf32, #tpu.memory_space<vmem>>, vector<4x340xf32>,
    %c0_103 = arith.constant 0 : index
    %c0_104 = arith.constant 0 : index
    %c0_105 = arith.constant 0 : index
    %84 = vector.load %arg3[%c0_103, %c0_104, %c0_105] : memref<1x4x128xf32, #tpu.memory_space<vmem>>, vector<1x4x44xf32>
    %85 = vector.shape_cast %84 : vector<1x4x44xf32> to vector<4x44xf32>
    %c56_106 = arith.constant 56 : index
    %c340 = arith.constant 340 : index
    %86 = vector.load %arg6[%c56_106, %c340] : memref<100x384xf32, #tpu.memory_space<vmem>>, vector<4x44xf32>
    tpu.vector_store %arg6[%c56_106, %c340], %85 {strides = array<i32>} : memref<100x384xf32, #tpu.memory_space<vmem>>, vector<4x44xf32>,
    %c0_107 = arith.constant 0 : index
    %c0_108 = arith.constant 0 : index
    %c60 = arith.constant 60 : index
    %87 = vector.load %arg2[%c0_107, %c0_108, %c60] : memref<1x4x384xf32, #tpu.memory_space<vmem>>, vector<1x4x324xf32>
    %88 = vector.shape_cast %87 : vector<1x4x324xf32> to vector<4x324xf32>
    %c60_109 = arith.constant 60 : index
    %c0_110 = arith.constant 0 : index
    %89 = vector.load %arg6[%c60_109, %c0_110] : memref<100x384xf32, #tpu.memory_space<vmem>>, vector<4x324xf32>
    tpu.vector_store %arg6[%c60_109, %c0_110], %88 {strides = array<i32>} : memref<100x384xf32, #tpu.memory_space<vmem>>, vector<4x324xf32>,
    %c0_111 = arith.constant 0 : index
    %c0_112 = arith.constant 0 : index
    %c0_113 = arith.constant 0 : index
    %90 = vector.load %arg3[%c0_111, %c0_112, %c0_113] : memref<1x4x128xf32, #tpu.memory_space<vmem>>, vector<1x4x60xf32>
    %91 = vector.shape_cast %90 : vector<1x4x60xf32> to vector<4x60xf32>
    %c60_114 = arith.constant 60 : index
    %c324 = arith.constant 324 : index
    %92 = vector.load %arg6[%c60_114, %c324] : memref<100x384xf32, #tpu.memory_space<vmem>>, vector<4x60xf32>
    tpu.vector_store %arg6[%c60_114, %c324], %91 {strides = array<i32>} : memref<100x384xf32, #tpu.memory_space<vmem>>, vector<4x60xf32>,
    %c0_115 = arith.constant 0 : index
    %c0_116 = arith.constant 0 : index
    %c61 = arith.constant 61 : index
    %93 = vector.load %arg2[%c0_115, %c0_116, %c61] : memref<1x4x384xf32, #tpu.memory_space<vmem>>, vector<1x4x323xf32>
    %94 = vector.shape_cast %93 : vector<1x4x323xf32> to vector<4x323xf32>
    %c64 = arith.constant 64 : index
    %c0_117 = arith.constant 0 : index
    %95 = vector.load %arg6[%c64, %c0_117] : memref<100x384xf32, #tpu.memory_space<vmem>>, vector<4x323xf32>
    tpu.vector_store %arg6[%c64, %c0_117], %94 {strides = array<i32>} : memref<100x384xf32, #tpu.memory_space<vmem>>, vector<4x323xf32>,
    %c0_118 = arith.constant 0 : index
    %c0_119 = arith.constant 0 : index
    %c0_120 = arith.constant 0 : index
    %96 = vector.load %arg3[%c0_118, %c0_119, %c0_120] : memref<1x4x128xf32, #tpu.memory_space<vmem>>, vector<1x4x61xf32>
    %97 = vector.shape_cast %96 : vector<1x4x61xf32> to vector<4x61xf32>
    %c64_121 = arith.constant 64 : index
    %c323 = arith.constant 323 : index
    %98 = vector.load %arg6[%c64_121, %c323] : memref<100x384xf32, #tpu.memory_space<vmem>>, vector<4x61xf32>
    tpu.vector_store %arg6[%c64_121, %c323], %97 {strides = array<i32>} : memref<100x384xf32, #tpu.memory_space<vmem>>, vector<4x61xf32>,
    %c0_122 = arith.constant 0 : index
    %c0_123 = arith.constant 0 : index
    %c62 = arith.constant 62 : index
    %99 = vector.load %arg2[%c0_122, %c0_123, %c62] : memref<1x4x384xf32, #tpu.memory_space<vmem>>, vector<1x4x322xf32>
    %100 = vector.shape_cast %99 : vector<1x4x322xf32> to vector<4x322xf32>
    %c68 = arith.constant 68 : index
    %c0_124 = arith.constant 0 : index
    %101 = vector.load %arg6[%c68, %c0_124] : memref<100x384xf32, #tpu.memory_space<vmem>>, vector<4x322xf32>
    tpu.vector_store %arg6[%c68, %c0_124], %100 {strides = array<i32>} : memref<100x384xf32, #tpu.memory_space<vmem>>, vector<4x322xf32>,
    %c0_125 = arith.constant 0 : index
    %c0_126 = arith.constant 0 : index
    %c0_127 = arith.constant 0 : index
    %102 = vector.load %arg3[%c0_125, %c0_126, %c0_127] : memref<1x4x128xf32, #tpu.memory_space<vmem>>, vector<1x4x62xf32>
    %103 = vector.shape_cast %102 : vector<1x4x62xf32> to vector<4x62xf32>
    %c68_128 = arith.constant 68 : index
    %c322 = arith.constant 322 : index
    %104 = vector.load %arg6[%c68_128, %c322] : memref<100x384xf32, #tpu.memory_space<vmem>>, vector<4x62xf32>
    tpu.vector_store %arg6[%c68_128, %c322], %103 {strides = array<i32>} : memref<100x384xf32, #tpu.memory_space<vmem>>, vector<4x62xf32>,
    %c0_129 = arith.constant 0 : index
    %c0_130 = arith.constant 0 : index
    %c63 = arith.constant 63 : index
    %105 = vector.load %arg2[%c0_129, %c0_130, %c63] : memref<1x4x384xf32, #tpu.memory_space<vmem>>, vector<1x4x321xf32>
    %106 = vector.shape_cast %105 : vector<1x4x321xf32> to vector<4x321xf32>
    %c72 = arith.constant 72 : index
    %c0_131 = arith.constant 0 : index
    %107 = vector.load %arg6[%c72, %c0_131] : memref<100x384xf32, #tpu.memory_space<vmem>>, vector<4x321xf32>
    tpu.vector_store %arg6[%c72, %c0_131], %106 {strides = array<i32>} : memref<100x384xf32, #tpu.memory_space<vmem>>, vector<4x321xf32>,
    %c0_132 = arith.constant 0 : index
    %c0_133 = arith.constant 0 : index
    %c0_134 = arith.constant 0 : index
    %108 = vector.load %arg3[%c0_132, %c0_133, %c0_134] : memref<1x4x128xf32, #tpu.memory_space<vmem>>, vector<1x4x63xf32>
    %109 = vector.shape_cast %108 : vector<1x4x63xf32> to vector<4x63xf32>
    %c72_135 = arith.constant 72 : index
    %c321 = arith.constant 321 : index
    %110 = vector.load %arg6[%c72_135, %c321] : memref<100x384xf32, #tpu.memory_space<vmem>>, vector<4x63xf32>
    tpu.vector_store %arg6[%c72_135, %c321], %109 {strides = array<i32>} : memref<100x384xf32, #tpu.memory_space<vmem>>, vector<4x63xf32>,
    %c0_136 = arith.constant 0 : index
    %c0_137 = arith.constant 0 : index
    %c64_138 = arith.constant 64 : index
    %111 = vector.load %arg2[%c0_136, %c0_137, %c64_138] : memref<1x4x384xf32, #tpu.memory_space<vmem>>, vector<1x4x320xf32>
    %112 = vector.shape_cast %111 : vector<1x4x320xf32> to vector<4x320xf32>
    %c76 = arith.constant 76 : index
    %c0_139 = arith.constant 0 : index
    %113 = vector.load %arg6[%c76, %c0_139] : memref<100x384xf32, #tpu.memory_space<vmem>>, vector<4x320xf32>
    tpu.vector_store %arg6[%c76, %c0_139], %112 {strides = array<i32>} : memref<100x384xf32, #tpu.memory_space<vmem>>, vector<4x320xf32>,
    %c0_140 = arith.constant 0 : index
    %c0_141 = arith.constant 0 : index
    %c0_142 = arith.constant 0 : index
    %114 = vector.load %arg3[%c0_140, %c0_141, %c0_142] : memref<1x4x128xf32, #tpu.memory_space<vmem>>, vector<1x4x64xf32>
    %115 = vector.shape_cast %114 : vector<1x4x64xf32> to vector<4x64xf32>
    %c76_143 = arith.constant 76 : index
    %c320 = arith.constant 320 : index
    %116 = vector.load %arg6[%c76_143, %c320] : memref<100x384xf32, #tpu.memory_space<vmem>>, vector<4x64xf32>
    tpu.vector_store %arg6[%c76_143, %c320], %115 {strides = array<i32>} : memref<100x384xf32, #tpu.memory_space<vmem>>, vector<4x64xf32>,
    %c0_144 = arith.constant 0 : index
    %c0_145 = arith.constant 0 : index
    %c80 = arith.constant 80 : index
    %117 = vector.load %arg2[%c0_144, %c0_145, %c80] : memref<1x4x384xf32, #tpu.memory_space<vmem>>, vector<1x4x304xf32>
    %118 = vector.shape_cast %117 : vector<1x4x304xf32> to vector<4x304xf32>
    %c80_146 = arith.constant 80 : index
    %c0_147 = arith.constant 0 : index
    %119 = vector.load %arg6[%c80_146, %c0_147] : memref<100x384xf32, #tpu.memory_space<vmem>>, vector<4x304xf32>
    tpu.vector_store %arg6[%c80_146, %c0_147], %118 {strides = array<i32>} : memref<100x384xf32, #tpu.memory_space<vmem>>, vector<4x304xf32>,
    %c0_148 = arith.constant 0 : index
    %c0_149 = arith.constant 0 : index
    %c0_150 = arith.constant 0 : index
    %120 = vector.load %arg3[%c0_148, %c0_149, %c0_150] : memref<1x4x128xf32, #tpu.memory_space<vmem>>, vector<1x4x80xf32>
    %121 = vector.shape_cast %120 : vector<1x4x80xf32> to vector<4x80xf32>
    %c80_151 = arith.constant 80 : index
    %c304 = arith.constant 304 : index
    %122 = vector.load %arg6[%c80_151, %c304] : memref<100x384xf32, #tpu.memory_space<vmem>>, vector<4x80xf32>
    tpu.vector_store %arg6[%c80_151, %c304], %121 {strides = array<i32>} : memref<100x384xf32, #tpu.memory_space<vmem>>, vector<4x80xf32>,
    %c0_152 = arith.constant 0 : index
    %c0_153 = arith.constant 0 : index
    %c81 = arith.constant 81 : index
    %123 = vector.load %arg2[%c0_152, %c0_153, %c81] : memref<1x4x384xf32, #tpu.memory_space<vmem>>, vector<1x4x303xf32>
    %124 = vector.shape_cast %123 : vector<1x4x303xf32> to vector<4x303xf32>
    %c84 = arith.constant 84 : index
    %c0_154 = arith.constant 0 : index
    %125 = vector.load %arg6[%c84, %c0_154] : memref<100x384xf32, #tpu.memory_space<vmem>>, vector<4x303xf32>
    tpu.vector_store %arg6[%c84, %c0_154], %124 {strides = array<i32>} : memref<100x384xf32, #tpu.memory_space<vmem>>, vector<4x303xf32>,
    %c0_155 = arith.constant 0 : index
    %c0_156 = arith.constant 0 : index
    %c0_157 = arith.constant 0 : index
    %126 = vector.load %arg3[%c0_155, %c0_156, %c0_157] : memref<1x4x128xf32, #tpu.memory_space<vmem>>, vector<1x4x81xf32>
    %127 = vector.shape_cast %126 : vector<1x4x81xf32> to vector<4x81xf32>
    %c84_158 = arith.constant 84 : index
    %c303 = arith.constant 303 : index
    %128 = vector.load %arg6[%c84_158, %c303] : memref<100x384xf32, #tpu.memory_space<vmem>>, vector<4x81xf32>
    tpu.vector_store %arg6[%c84_158, %c303], %127 {strides = array<i32>} : memref<100x384xf32, #tpu.memory_space<vmem>>, vector<4x81xf32>,
    %c0_159 = arith.constant 0 : index
    %c0_160 = arith.constant 0 : index
    %c82 = arith.constant 82 : index
    %129 = vector.load %arg2[%c0_159, %c0_160, %c82] : memref<1x4x384xf32, #tpu.memory_space<vmem>>, vector<1x4x302xf32>
    %130 = vector.shape_cast %129 : vector<1x4x302xf32> to vector<4x302xf32>
    %c88 = arith.constant 88 : index
    %c0_161 = arith.constant 0 : index
    %131 = vector.load %arg6[%c88, %c0_161] : memref<100x384xf32, #tpu.memory_space<vmem>>, vector<4x302xf32>
    tpu.vector_store %arg6[%c88, %c0_161], %130 {strides = array<i32>} : memref<100x384xf32, #tpu.memory_space<vmem>>, vector<4x302xf32>,
    %c0_162 = arith.constant 0 : index
    %c0_163 = arith.constant 0 : index
    %c0_164 = arith.constant 0 : index
    %132 = vector.load %arg3[%c0_162, %c0_163, %c0_164] : memref<1x4x128xf32, #tpu.memory_space<vmem>>, vector<1x4x82xf32>
    %133 = vector.shape_cast %132 : vector<1x4x82xf32> to vector<4x82xf32>
    %c88_165 = arith.constant 88 : index
    %c302 = arith.constant 302 : index
    %134 = vector.load %arg6[%c88_165, %c302] : memref<100x384xf32, #tpu.memory_space<vmem>>, vector<4x82xf32>
    tpu.vector_store %arg6[%c88_165, %c302], %133 {strides = array<i32>} : memref<100x384xf32, #tpu.memory_space<vmem>>, vector<4x82xf32>,
    %c0_166 = arith.constant 0 : index
    %c0_167 = arith.constant 0 : index
    %c83 = arith.constant 83 : index
    %135 = vector.load %arg2[%c0_166, %c0_167, %c83] : memref<1x4x384xf32, #tpu.memory_space<vmem>>, vector<1x4x301xf32>
    %136 = vector.shape_cast %135 : vector<1x4x301xf32> to vector<4x301xf32>
    %c92 = arith.constant 92 : index
    %c0_168 = arith.constant 0 : index
    %137 = vector.load %arg6[%c92, %c0_168] : memref<100x384xf32, #tpu.memory_space<vmem>>, vector<4x301xf32>
    tpu.vector_store %arg6[%c92, %c0_168], %136 {strides = array<i32>} : memref<100x384xf32, #tpu.memory_space<vmem>>, vector<4x301xf32>,
    %c0_169 = arith.constant 0 : index
    %c0_170 = arith.constant 0 : index
    %c0_171 = arith.constant 0 : index
    %138 = vector.load %arg3[%c0_169, %c0_170, %c0_171] : memref<1x4x128xf32, #tpu.memory_space<vmem>>, vector<1x4x83xf32>
    %139 = vector.shape_cast %138 : vector<1x4x83xf32> to vector<4x83xf32>
    %c92_172 = arith.constant 92 : index
    %c301 = arith.constant 301 : index
    %140 = vector.load %arg6[%c92_172, %c301] : memref<100x384xf32, #tpu.memory_space<vmem>>, vector<4x83xf32>
    tpu.vector_store %arg6[%c92_172, %c301], %139 {strides = array<i32>} : memref<100x384xf32, #tpu.memory_space<vmem>>, vector<4x83xf32>,
    %c0_173 = arith.constant 0 : index
    %c0_174 = arith.constant 0 : index
    %c84_175 = arith.constant 84 : index
    %141 = vector.load %arg2[%c0_173, %c0_174, %c84_175] : memref<1x4x384xf32, #tpu.memory_space<vmem>>, vector<1x4x300xf32>
    %142 = vector.shape_cast %141 : vector<1x4x300xf32> to vector<4x300xf32>
    %c96 = arith.constant 96 : index
    %c0_176 = arith.constant 0 : index
    %143 = vector.load %arg6[%c96, %c0_176] : memref<100x384xf32, #tpu.memory_space<vmem>>, vector<4x300xf32>
    tpu.vector_store %arg6[%c96, %c0_176], %142 {strides = array<i32>} : memref<100x384xf32, #tpu.memory_space<vmem>>, vector<4x300xf32>,
    %c0_177 = arith.constant 0 : index
    %c0_178 = arith.constant 0 : index
    %c0_179 = arith.constant 0 : index
    %144 = vector.load %arg3[%c0_177, %c0_178, %c0_179] : memref<1x4x128xf32, #tpu.memory_space<vmem>>, vector<1x4x84xf32>
    %145 = vector.shape_cast %144 : vector<1x4x84xf32> to vector<4x84xf32>
    %c96_180 = arith.constant 96 : index
    %c300 = arith.constant 300 : index
    %146 = vector.load %arg6[%c96_180, %c300] : memref<100x384xf32, #tpu.memory_space<vmem>>, vector<4x84xf32>
    tpu.vector_store %arg6[%c96_180, %c300], %145 {strides = array<i32>} : memref<100x384xf32, #tpu.memory_space<vmem>>, vector<4x84xf32>,
    %c0_181 = arith.constant 0 : index
    %c0_182 = arith.constant 0 : index
    %147 = vector.load %arg4[%c0_181, %c0_182] : memref<12x100xf32, #tpu.memory_space<vmem>>, vector<12x100xf32>
    %c0_183 = arith.constant 0 : index
    %c0_184 = arith.constant 0 : index
    %148 = vector.load %arg6[%c0_183, %c0_184] : memref<100x384xf32, #tpu.memory_space<vmem>>, vector<100x384xf32>
    %cst = arith.constant dense<0.000000e+00> : vector<12x384xf32>
    %149 = tpu.matmul %147, %148, %cst {dimension_numbers = #tpu.dot_dimension_numbers<[1], [0], [0], [1], [0, 0, 1, 1], [], []>} : vector<12x100xf32>, vector<100x384xf32>, vector<12x384xf32> -> vector<12x384xf32>
    %c0_185 = arith.constant 0 : index
    %c0_186 = arith.constant 0 : index
    %c0_187 = arith.constant 0 : index
    %150 = vector.load %arg5[%c0_185, %c0_186, %c0_187] : memref<1x12x384xf32, #tpu.memory_space<vmem>>, vector<1x12x384xf32>
    %151 = vector.shape_cast %150 : vector<1x12x384xf32> to vector<12x384xf32>
    %152 = vector.shape_cast %149 : vector<12x384xf32> to vector<1x12x384xf32>
    tpu.vector_store %arg5[%c0_185, %c0_186, %c0_187], %152 {strides = array<i32>} : memref<1x12x384xf32, #tpu.memory_space<vmem>>, vector<1x12x384xf32>,
    return
  }
  func.func @transform_0(%arg0: i32, %arg1: i32) -> (i32, i32, i32) {
    %c0_i32 = arith.constant 0 : i32
    %c0_i32_0 = arith.constant 0 : i32
    return %arg0, %c0_i32, %arg1 : i32, i32, i32
  }
  func.func @transform_1(%arg0: i32, %arg1: i32) -> (i32, i32, i32) {
    %c1_i32 = arith.constant 1 : i32
    %0 = arith.addi %arg1, %c1_i32 : i32
    %c3_i32 = arith.constant 3 : i32
    %1 = arith.muli %0, %c3_i32 : i32
    %c0_i32 = arith.constant 0 : i32
    %c0_i32_0 = arith.constant 0 : i32
    return %arg0, %c0_i32, %1 : i32, i32, i32
  }
  func.func @transform_2(%arg0: i32, %arg1: i32) -> (i32, i32) {
    %c0_i32 = arith.constant 0 : i32
    %c0_i32_0 = arith.constant 0 : i32
    %c0_i32_1 = arith.constant 0 : i32
    return %c0_i32, %c0_i32_0 : i32, i32
  }
  func.func @transform_3(%arg0: i32, %arg1: i32) -> (i32, i32, i32) {
    %c0_i32 = arith.constant 0 : i32
    %c0_i32_0 = arith.constant 0 : i32
    return %arg0, %c0_i32, %arg1 : i32, i32, i32
  }
}

</mosaic_0001>

<bundles_post_ra>
// kernel: gabor_square_forward.1
= control target key start
LH: loop header
LB: loop body
LE: loop exit
PB: predicated region body
PF: predicated region fallthrough
CT: control target
= control target key end

     0   :  { %s1547_s12 = smov 0   ;;  %s1549_s13 = smov 0   ;;  %s1875_s0 = inlined_call_operand.vmem [shape: f32[2,4,520], index: 0, kind: input, shape index: {}, may-alias: {0,1}]   ;;  %s1876_s1 = inlined_call_operand.vmem [shape: f32[2,4,520], index: 1, kind: input, shape index: {}, may-alias: {0,1}]   ;;  %s1877_s2 = inlined_call_operand.vmem [shape: f32[12,100], index: 2, kind: input, shape index: {}]   ;;  %s1878_s3 = inlined_call_operand.vmem [shape: f32[2,12,384], index: 3, kind: output, shape index: {}]  }
   0x1   :  { %s1551_s14 = smov 0  }
   0x2 LB: > { %s25_s15 = sadd.s32 1, %s1496_s13  ;;  %p1304_p0 = scmp.ge.s32.totalorder %s1500_s14, 1  ;;  %s1500_s14 = sphi %s1551_s14, %s13_s14   ;;  %s1496_s13 = sphi %s1549_s13, %s1880_s13   ;;  %s1492_s12 = sphi %s1547_s12, %s1879_s12  }
   0x3   : > { %p27_p1 = scmp.ge.s32.totalorder %s25_s15, 2  ;;  %p189_p2 = scmp.lt.s32.totalorder %s1500_s14, 3 }
   0x5   : > { %s1882_s15 = smov (%p27_p1, %s25_s15), 0  ;;  %p190_p3 = pnand %p1304_p0, %p189_p2 }
   0x6   : > { %p240_p4 = scmp.lt.s32.totalorder (!%p190_p3), %s1492_s12, 1  ;;  %s1502_s20 = smov (!%p190_p3), 126   ;;  %vm332_vm0 = vcmask (!%p190_p3), 1027072   ;;  %vm324_vm1 = vcmask (!%p190_p3), 1031168   ;;  %vm353_vm2 = vcmask (!%p190_p3), 1022976   ;;  %vm361_vm3 = vcmask (!%p190_p3), 1022980  }
   0x7   : > { %193 = sbr.rel (%p190_p3) target bundleno = 550 (0x226), region = 32  ;;  %s1503_s21 = smov (!%p190_p3), 127   ;;  %vm295_vm4 = vcmask (!%p190_p3), 1039360   ;;  %vm303_vm5 = vcmask (!%p190_p3), 1039364   ;;  %vm382_vm6 = vcmask (!%p190_p3), 1014784   ;;  %vm390_vm7 = vcmask (!%p190_p3), 1010688  }
   0x8   : > { %s1504_s22 = smov (!%p190_p3), 125   ;;  %s1505_s23 = smov (!%p190_p3), 124   ;;  %vm411_vm8 = vcmask (!%p190_p3), 883712   ;;  %vm419_vm9 = vcmask (!%p190_p3), 883716   ;;  %vm440_vm10 = vcmask (!%p190_p3), 875520   ;;  %vm448_vm11 = vcmask (!%p190_p3), 871424  }
   0x9   : > { %s1506_s25 = smov (!%p190_p3), 108   ;;  %s1507_s29 = smov (!%p190_p3), 107   ;;  %vm311_vm12 = vcmask (!%p190_p3), 1048572   ;;  %vm469_vm13 = vcmask (!%p190_p3), 867328   ;;  %vm477_vm14 = vcmask (!%p190_p3), 867332   ;;  %vm369_vm15 = vcmask (!%p190_p3), 1048556  }
   0xa   : > { %s1508_s30 = smov (!%p190_p3), 106   ;;  %s1509_s4 = smov (!%p190_p3), 105  }
   0xb   : > { %s1510_s5 = smov (!%p190_p3), 104   ;;  %s1511_s6 = smov (!%p190_p3), 88  }
   0xc   : > { %s1512_s7 = smov (!%p190_p3), 87   ;;  %s1513_s8 = smov (!%p190_p3), 86  }
   0xd   : > { %s1514_s9 = smov (!%p190_p3), 85   ;;  %s1515_s10 = smov (!%p190_p3), 84  }
   0xe   : > { %s1884_s12 = smov (!%p240_p4, %s1492_s12), 1  ;;  %s1516_s11 = smov 68  }
   0xf   : > { %s1411_s16 = smul.u32 20, %s1884_s12  ;;  %s1518_s17 = smov 66  }
  0x10   : > { %s1519_s18 = smov 65  }
  0x11   : > { %s1571_s19 = scalar_lea.vmem %s1875_s0, %s1411_s16  ;;  %s1318_s24 = sadd.s32 12, %s1411_s16 }
  0x12   : > { %v314_v0 = vld [vmem:[%s1571_s19 + $0x8] sm:$0xf]  ;;  %v1575_v1 = vld [vmem:[%s1571_s19] sm:$0xff]  ;;  %s1615_s28 = scalar_lea.vmem %s1876_s1, %s1318_s24  ;;  %s1517_s16 = smov 67  }
  0x13   : > { %322 = vrot.lane.b32.xlu1 %v314_v0, %s1502_s20  ;;  %291 = vrot.lane.b32.xlu0 %v1575_v1, %s1503_s21  ;;  %v1582_v2 = vcombine.high %v1575_v1, %v1575_v1  ;;  %280 = vst [vmem:[#allocation2] sm:$0xf] %v1575_v1  ;;  %v1466_v3 = vld [vmem:[%s1571_s19 + $0x8] ss:$0 sps:$4 sm:$0xff]   ;;  %v1594_v5 = vcombine.low %v1575_v1, %v1575_v1  ;;  %v305_v10 = vld [vmem:[%s1615_s28] sm:$0xf] }
  0x14   : > { %v1467_v4 = vld [vmem:[%s1571_s19 + $0x8] ss:$0 sps:$4 sm:$0xff]   ;;  %v307_v11 = vrot.slane %v305_v10, 4  ;;  %v363_v13 = vld [vmem:[%s1615_s28] sm:$0xf]  ;;  %s1524_s24 = smov 45  }
  0x15   : > { %281 = vst [vmem:[#allocation2 + $0x8] sm:$0xf] %v1582_v2  ;;  %v372_v6 = vld [vmem:[%s1571_s19 + $0x8] sm:$0xf]  ;;  %v365_v14 = vrot.slane %v363_v13, 4 }
  0x16   : > { %v1468_v7 = vld [vmem:[%s1571_s19 + $0x8] ss:$0 sps:$4 sm:$0xff]   ;;  %v334_v15 = vld [vmem:[%s1615_s28] sm:$0xf] }
  0x17   : > { %320 = vrot.lane.b32.xlu1 %v1582_v2, %s1502_s20  ;;  %349 = vrot.lane.b32.xlu0 %v1575_v1, %s1504_s22  ;;  %v276_v8 = vld [vmem:[%s1571_s19 + $0x8] sm:$0xf]  ;;  %v421_v20 = vld [vmem:[%s1615_s28] sm:$0xf] }
  0x18   : > { %282 = vst [vmem:[#allocation2 + $0x10] sm:$0xf] %v276_v8  ;;  %v430_v9 = vld [vmem:[%s1571_s19 + $0x8] sm:$0xf]  ;;  %v423_v21 = vrot.slane %v421_v20, 4 }
  0x19   : > { %v1469_v12 = vld [vmem:[%s1571_s19 + $0x8] ss:$0 sps:$4 sm:$0xff]   ;;  %v392_v22 = vld [vmem:[%s1615_s28] sm:$0xf] }
  0x1a   : > { %v488_v16 = vld [vmem:[%s1571_s19 + $0x8] sm:$0xf]  ;;  %v479_v23 = vld [vmem:[%s1615_s28] sm:$0xf] }
  0x1b   : > { %351 = vrot.lane.b32.xlu1 %v1466_v3, %s1504_s22  ;;  %293 = vrot.lane.b32.xlu0 %v1467_v4, %s1503_s21  ;;  %v1470_v17 = vld [vmem:[%s1571_s19 + $0x8] ss:$0 sps:$4 sm:$0xff]   ;;  %v481_v24 = vrot.slane %v479_v23, 4  ;;  %v450_v25 = vld [vmem:[%s1615_s28] sm:$0xf] }
  0x1c   : > { %v546_v18 = vld [vmem:[%s1571_s19 + $0x8] sm:$0xf]  ;;  %v537_v30 = vld [vmem:[%s1615_s28] sm:$0xf] }
  0x1d   : > { %v1471_v19 = vld [vmem:[%s1571_s19 + $0x8] ss:$0 sps:$4 sm:$0xff]   ;;  %v539_v31 = vrot.slane %v537_v30, 4  ;;  %v508_v32 = vld [vmem:[%s1615_s28] sm:$0xf] }
  0x1e   : > { %v604_v26 = vld [vmem:[%s1571_s19 + $0x8] sm:$0xf]  ;;  %v595_v33 = vld [vmem:[%s1615_s28] sm:$0xf] }
  0x1f   : > { %318 = vrot.lane.b32.xlu1 %v1575_v1, %s1502_s20  ;;  %289 = vrot.lane.b32.xlu0 %v1594_v5, %s1503_s21  ;;  %v1472_v27 = vld [vmem:[%s1571_s19 + $0x8] ss:$0 sps:$4 sm:$0xff]   ;;  %v597_v34 = vrot.slane %v595_v33, 4  ;;  %v566_v35 = vld [vmem:[%s1615_s28] sm:$0xf] }
  0x20   : > { %v662_v28 = vld [vmem:[%s1571_s19 + $0x8] sm:$0xf]  ;;  %v653_v45 = vld [vmem:[%s1615_s28] sm:$0xf] }
  0x21   : > { %v1473_v29 = vld [vmem:[%s1571_s19 + $0x8] ss:$0 sps:$4 sm:$0xff]   ;;  %v655_v50 = vrot.slane %v653_v45, 4  ;;  %v624_v51 = vld [vmem:[%s1615_s28] sm:$0xf] }
  0x22   : > { %v720_v36 = vld [vmem:[%s1571_s19 + $0x8] sm:$0xf]  ;;  %v711_v52 = vld [vmem:[%s1615_s28] sm:$0xf] }
  0x23   : > { %378 = vrot.lane.b32.xlu1 %v1582_v2, %s1505_s23  ;;  %347 = vrot.lane.b32.xlu0 %v1594_v5, %s1504_s22  ;;  %v1474_v37 = vld [vmem:[%s1571_s19 + $0x8] ss:$0 sps:$4 sm:$0xff]   ;;  %v713_v57 = vrot.slane %v711_v52, 4  ;;  %v682_v58 = vld [vmem:[%s1615_s28] sm:$0xf] }
  0x24   : > { %v778_v40 = vld [vmem:[%s1571_s19 + $0x8] sm:$0xf] }
  0x25   : > { %v1475_v44 = vld [vmem:[%s1571_s19 + $0x8] ss:$0 sps:$4 sm:$0xff]  }
  0x26   : > { %v836_v13 = vld [vmem:[%s1571_s19 + $0x8] sm:$0xf] }
  0x27   : > { %407 = vrot.lane.b32.xlu1 %v1575_v1, %s1506_s25  ;;  %380 = vrot.lane.b32.xlu0 %v372_v6, %s1505_s23 }
  0x2b   : > { %436 = vrot.lane.b32.xlu1 %v1582_v2, %s1507_s29  ;;  %409 = vrot.lane.b32.xlu0 %v1468_v7, %s1506_s25 }
  0x2f   : > { %465 = vrot.lane.b32.xlu1 %v1575_v1, %s1508_s30  ;;  %438 = vrot.lane.b32.xlu0 %v430_v9, %s1507_s29 }
  0x33   : > { %308 = vrot.lane.b32.xlu1 %v307_v11, %s1503_s21  ;;  %467 = vrot.lane.b32.xlu0 %v1469_v12, %s1508_s30  ;;  %s1521_s21 = smov 48  }
  0x37   : > { %366 = vrot.lane.b32.xlu1 %v365_v14, %s1504_s22  ;;  %336 = vrot.lane.b32.xlu0 %v334_v15, %s1502_s20  ;;  %s1520_s20 = smov 64   ;;  %s1522_s22 = smov 47  }
  0x3b   : > { %405 = vrot.lane.b32.xlu1 %v1594_v5, %s1506_s25  ;;  %376 = vrot.lane.b32.xlu0 %v1575_v1, %s1505_s23 }
  0x3f   : > { %463 = vrot.lane.b32.xlu1 %v1594_v5, %s1508_s30  ;;  %434 = vrot.lane.b32.xlu0 %v1575_v1, %s1507_s29 }
  0x43   : > { %496 = vrot.lane.b32.xlu1 %v488_v16, %s1509_s4  ;;  %494 = vrot.lane.b32.xlu0 %v1582_v2, %s1509_s4 }
  0x47   : > { %525 = vrot.lane.b32.xlu1 %v1470_v17, %s1510_s5  ;;  %523 = vrot.lane.b32.xlu0 %v1575_v1, %s1510_s5  ;;  %v1476_v17 = vld [vmem:[%s1571_s19 + $0x8] ss:$0 sps:$4 sm:$0xff]  }
  0x4b   : > { %554 = vrot.lane.b32.xlu1 %v546_v18, %s1511_s6  ;;  %552 = vrot.lane.b32.xlu0 %v1582_v2, %s1511_s6 }
  0x4f   : > { %583 = vrot.lane.b32.xlu1 %v1471_v19, %s1512_s7  ;;  %581 = vrot.lane.b32.xlu0 %v1575_v1, %s1512_s7 }
  0x53   : > { %424 = vrot.lane.b32.xlu1 %v423_v21, %s1506_s25  ;;  %394 = vrot.lane.b32.xlu0 %v392_v22, %s1505_s23  ;;  %v894_v21 = vld [vmem:[%s1571_s19 + $0x8] sm:$0xf]  ;;  %s1523_s23 = smov 46   ;;  %s1525_s25 = smov 44  }
  0x57   : > { %482 = vrot.lane.b32.xlu1 %v481_v24, %s1508_s30  ;;  %452 = vrot.lane.b32.xlu0 %v450_v25, %s1507_s29  ;;  %v1477_v24 = vld [vmem:[%s1571_s19 + $0x8] ss:$0 sps:$4 sm:$0xff]   ;;  %v769_v25 = vld [vmem:[%s1615_s28] sm:$0xf]  ;;  %s1413_s29 = smul.u32 48, %s1884_s12 }
  0x58   : > { %v771_v33 = vrot.slane %v769_v25, 4 }
  0x5b   : > { %521 = vrot.lane.b32.xlu1 %v1594_v5, %s1510_s5  ;;  %492 = vrot.lane.b32.xlu0 %v1575_v1, %s1509_s4 }
  0x5f   : > { %579 = vrot.lane.b32.xlu1 %v1594_v5, %s1512_s7  ;;  %550 = vrot.lane.b32.xlu0 %v1575_v1, %s1511_s6 }
  0x63   : > { %612 = vrot.lane.b32.xlu1 %v604_v26, %s1513_s8  ;;  %610 = vrot.lane.b32.xlu0 %v1582_v2, %s1513_s8 }
  0x67   : > { %641 = vrot.lane.b32.xlu1 %v1472_v27, %s1514_s9  ;;  %639 = vrot.lane.b32.xlu0 %v1575_v1, %s1514_s9 }
  0x6b   : > { %670 = vrot.lane.b32.xlu1 %v662_v28, %s1515_s10  ;;  %668 = vrot.lane.b32.xlu0 %v1582_v2, %s1515_s10 }
  0x6f   : > { %699 = vrot.lane.b32.xlu1 %v1473_v29, %s1516_s11  ;;  %697 = vrot.lane.b32.xlu0 %v1575_v1, %s1516_s11 }
  0x73   : > { %540 = vrot.lane.b32.xlu1 %v539_v31, %s1510_s5  ;;  %510 = vrot.lane.b32.xlu0 %v508_v32, %s1509_s4  ;;  %s273_s5 = scalar_lea.vmem %s1878_s3, %s1413_s29 }
  0x77   : > { %598 = vrot.lane.b32.xlu1 %v597_v34, %s1512_s7  ;;  %568 = vrot.lane.b32.xlu0 %v566_v35, %s1511_s6  ;;  %v740_v35 = vld [vmem:[%s1615_s28] sm:$0xf] }
  0x7b   : > { %637 = vrot.lane.b32.xlu1 %v1594_v5, %s1514_s9  ;;  %608 = vrot.lane.b32.xlu0 %v1575_v1, %s1513_s8 }
  0x7f   : > { %695 = vrot.lane.b32.xlu1 %v1594_v5, %s1516_s11  ;;  %666 = vrot.lane.b32.xlu0 %v1575_v1, %s1515_s10 }
  0x83   : > { %728 = vrot.lane.b32.xlu1 %v720_v36, %s1517_s16  ;;  %726 = vrot.lane.b32.xlu0 %v1582_v2, %s1517_s16  ;;  %v827_v36 = vld [vmem:[%s1615_s28] sm:$0xf] }
  0x85   : > { %v323_v38 = vpop.permute.xlu1 %322  ;;  %v292_v39 = vpop.permute.xlu0 %291 }
  0x86   : > { %333 = vst.msk [vmem:[#allocation2 + $0x28] sm:$0xf] %vm332_vm0, %v323_v38  ;;  %vm339_vm0 = vcmask 1044464  }
  0x87   : > { %757 = vrot.lane.b32.xlu1 %v1474_v37, %s1518_s17  ;;  %755 = vrot.lane.b32.xlu0 %v1575_v1, %s1518_s17 }
  0x89   : > { %v321_v41 = vpop.permute.xlu1 %320  ;;  %v350_v42 = vpop.permute.xlu0 %349 }
  0x8a   : > { %v326_v43 = vsel %vm324_vm1, %v321_v41, %v323_v38 }
  0x8b   : > { %331 = vst [vmem:[#allocation2 + $0x20] sm:$0xf] %v326_v43  ;;  %786 = vrot.lane.b32.xlu1 %v778_v40, %s1519_s18  ;;  %784 = vrot.lane.b32.xlu0 %v1582_v2, %s1519_s18  ;;  %v829_v43 = vrot.slane %v827_v36, 4 }
  0x8d   : > { %v352_v46 = vpop.permute.xlu1 %351  ;;  %v294_v47 = vpop.permute.xlu0 %293 }
  0x8e   : > { %v355_v48 = vsel %vm353_vm2, %v350_v42, %v352_v46  ;;  %362 = vst.msk [vmem:[#allocation2 + $0x28] sm:$0xf0] %vm361_vm3, %v352_v46  ;;  %v297_v49 = vsel %vm295_vm4, %v292_v39, %v294_v47  ;;  %vm535_vm3 = vcmask 850948  }
  0x8f   : > { %304 = vst.msk [vmem:[#allocation2 + $0x10] sm:$0xf0] %vm303_vm5, %v294_v47  ;;  %360 = vst [vmem:[#allocation2 + $0x20] sm:$0xf0] %v355_v48  ;;  %815 = vrot.lane.b32.xlu1 %v1475_v44, %s1520_s20  ;;  %813 = vrot.lane.b32.xlu0 %v1575_v1, %s1520_s20  ;;  %v798_v44 = vld [vmem:[%s1615_s28] sm:$0xf] }
  0x90   : > { %302 = vst [vmem:[#allocation2 + $0x8] sm:$0xf0] %v297_v49  ;;  %vm564_vm5 = vcmask 715776  }
  0x91   : > { %v319_v53 = vpop.permute.xlu1 %318  ;;  %v290_v54 = vpop.permute.xlu0 %289 }
  0x92   : > { %v325_v55 = vsel %vm324_vm1, %v319_v53, %v321_v41  ;;  %v296_v56 = vsel %vm295_vm4, %v290_v54, %v292_v39  ;;  %vm506_vm1 = vcmask 855040   ;;  %vm527_vm4 = vcmask 850944   ;;  %v885_v54 = vld [vmem:[%s1615_s28] sm:$0xf] }
  0x93   : > { %330 = vst [vmem:[#allocation2 + $0x18] sm:$0xf] %v325_v55  ;;  %301 = vst [vmem:[#allocation2] sm:$0xf0] %v296_v56  ;;  %656 = vrot.lane.b32.xlu1 %v655_v50, %s1514_s9  ;;  %626 = vrot.lane.b32.xlu0 %v624_v51, %s1513_s8 }
  0x95   : > { %v1731_v59 = vpop.permute.xlu1 %378  ;;  %v348_v60 = vpop.permute.xlu0 %347 }
  0x96   : > { %v354_v61 = vsel %vm353_vm2, %v348_v60, %v350_v42  ;;  %v985_v63 = vld [vmem:[#allocation2 + $0x20] sm:$0xff]  ;;  %vm498_vm2 = vcmask 859136  }
  0x97   : > { %v982_v62 = vld [vmem:[#allocation2 + $0x8] sm:$0xff]  ;;  %359 = vst [vmem:[#allocation2 + $0x18] sm:$0xf0] %v354_v61  ;;  %714 = vrot.lane.b32.xlu1 %v713_v57, %s1516_s11  ;;  %684 = vrot.lane.b32.xlu0 %v682_v58, %s1515_s10  ;;  %v887_v58 = vrot.slane %v885_v54, 4  ;;  %v943_v60 = vld [vmem:[%s1615_s28] sm:$0xf] }
  0x98   : > { %v1363_v0 = vpack.c.bf16 %v985_v63, %v982_v62 }
  0x99   : > { %v408_v3 = vpop.permute.xlu1 %407  ;;  %v381_v4 = vpop.permute.xlu0 %380 }
  0x9a   : > { %1364 = vmatprep.subr.bf16.mxu0 %v1363_v0  ;;  %v384_v6 = vsel %vm382_vm6, %v1731_v59, %v381_v4  ;;  %391 = vst.msk [vmem:[#allocation2 + $0x40] sm:$0xf] %vm390_vm7, %v381_v4  ;;  %v981_v10 = vld [vmem:[#allocation2] sm:$0xff]  ;;  %vm593_vm7 = vcmask 711684  }
  0x9b   : > { %389 = vst [vmem:[#allocation2 + $0x38] sm:$0xf] %v384_v6  ;;  %753 = vrot.lane.b32.xlu1 %v1594_v5, %s1518_s17  ;;  %724 = vrot.lane.b32.xlu0 %v1575_v1, %s1517_s16  ;;  %v914_v0 = vld [vmem:[%s1615_s28] sm:$0xf]  ;;  %v952_v6 = vld [vmem:[%s1571_s19 + $0x8] sm:$0xf] }
  0x9d   : > { %v1742_v7 = vpop.permute.xlu1 %436  ;;  %v410_v8 = vpop.permute.xlu0 %409 }
  0x9e   : > { %v413_v9 = vsel %vm411_vm8, %v408_v3, %v410_v8  ;;  %420 = vst.msk [vmem:[#allocation2 + $0x40] sm:$0xf0] %vm419_vm9, %v410_v8  ;;  %v984_v11 = vld [vmem:[#allocation2 + $0x18] sm:$0xff]  ;;  %vm427_vm9 = vcmask 1048420  }
  0x9f   : > { %418 = vst [vmem:[#allocation2 + $0x38] sm:$0xf0] %v413_v9  ;;  %811 = vrot.lane.b32.xlu1 %v1594_v5, %s1520_s20  ;;  %782 = vrot.lane.b32.xlu0 %v1575_v1, %s1519_s18  ;;  %v1365_v12 = vpack.c.bf16 %v984_v11, %v981_v10 }
  0xa1   : > { %v466_v14 = vpop.permute.xlu1 %465  ;;  %v439_v15 = vpop.permute.xlu0 %438  ;;  %1366 = vmatpush1.bf16.msra.mxu0 %v1365_v12  ;;  %v1816_v12 = vld [vmem:[%s1877_s2] sm:$0xff] }
  0xa2   : > { %v442_v16 = vsel %vm440_vm10, %v1742_v7, %v439_v15  ;;  %449 = vst.msk [vmem:[#allocation2 + $0x58] sm:$0xf] %vm448_vm11, %v439_v15  ;;  %vm485_vm11 = vcmask 1048404  }
  0xa3   : > { %447 = vst [vmem:[#allocation2 + $0x50] sm:$0xf] %v442_v16  ;;  %844 = vrot.lane.b32.xlu1 %v836_v13, %s1521_s21  ;;  %842 = vrot.lane.b32.xlu0 %v1582_v2, %s1521_s21  ;;  %v972_v13 = vld [vmem:[%s1615_s28] sm:$0xf] }
  0xa5   : > { %v309_v18 = vpop.permute.xlu1 %308  ;;  %v468_v19 = vpop.permute.xlu0 %467 }
  0xa6   : > { %312 = vst.msk [vmem:[#allocation2 + $0x10] sm:$0xf0] %vm311_vm12, %v309_v18  ;;  %v471_v20 = vsel %vm469_vm13, %v466_v14, %v468_v19  ;;  %v988_v30 = vld [vmem:[#allocation2 + $0x38] sm:$0xff]  ;;  %vm455_vm12 = vcmask 1044312  }
  0xa7   : > { %478 = vst.msk [vmem:[#allocation2 + $0x58] sm:$0xf0] %vm477_vm14, %v468_v19  ;;  %476 = vst [vmem:[#allocation2 + $0x50] sm:$0xf0] %v471_v20  ;;  %873 = vrot.lane.b32.xlu1 %v1476_v17, %s1522_s22  ;;  %871 = vrot.lane.b32.xlu0 %v1575_v1, %s1522_s22  ;;  %vm622_vm14 = vcmask 699392  }
  0xa9   : > { %v367_v22 = vpop.permute.xlu1 %366  ;;  %v337_v23 = vpop.permute.xlu0 %336 }
  0xaa   : > { %370 = vst.msk [vmem:[#allocation2 + $0x28] sm:$0xf0] %vm369_vm15, %v367_v22  ;;  %vm614_vm15 = vcmask 703488  }
  0xab   : > { %340 = vst.msk [vmem:[#allocation2 + $0x28] sm:$0xf] %vm339_vm0, %v337_v23  ;;  %902 = vrot.lane.b32.xlu1 %v894_v21, %s1523_s23  ;;  %900 = vrot.lane.b32.xlu0 %v1582_v2, %s1523_s23  ;;  %vm651_vm0 = vcmask 695300  }
  0xad   : > { %v406_v26 = vpop.permute.xlu1 %405  ;;  %v377_v27 = vpop.permute.xlu0 %376  ;;  %v983_v34 = vld [vmem:[#allocation2 + $0x10] sm:$0xff] }
  0xae   : > { %v412_v28 = vsel %vm411_vm8, %v406_v26, %v408_v3  ;;  %v383_v29 = vsel %vm382_vm6, %v377_v27, %v1731_v59  ;;  %v991_v31 = vld [vmem:[#allocation2 + $0x50] sm:$0xff]  ;;  %vm556_vm6 = vcmask 719872   ;;  %vm585_vm8 = vcmask 711680   ;;  %v856_v59 = vld [vmem:[%s1615_s28] sm:$0xf] }
  0xaf   : > { %417 = vst [vmem:[#allocation2 + $0x30] sm:$0xf0] %v412_v28  ;;  %388 = vst [vmem:[#allocation2 + $0x30] sm:$0xf] %v383_v29  ;;  %931 = vrot.lane.b32.xlu1 %v1477_v24, %s1524_s24  ;;  %929 = vrot.lane.b32.xlu0 %v1575_v1, %s1524_s24  ;;  %v1367_v32 = vpack.c.bf16 %v991_v31, %v988_v30 }
  0xb1   : > { %v464_v37 = vpop.permute.xlu1 %463  ;;  %v435_v38 = vpop.permute.xlu0 %434  ;;  %1368 = vmatprep.subr.bf16.mxu0 %v1367_v32 }
  0xb2   : > { %v986_v39 = vld [vmem:[#allocation2 + $0x28] sm:$0xff]  ;;  %v470_v40 = vsel %vm469_vm13, %v464_v37, %v466_v14  ;;  %v441_v41 = vsel %vm440_vm10, %v435_v38, %v1742_v7  ;;  %vm397_vm10 = vcmask 1044448   ;;  %vm1020_vm13 = vcmask 818176  }
  0xb3   : > { %v1387_v42 = vpack.c.bf16 %v986_v39, %v983_v34  ;;  %475 = vst [vmem:[#allocation2 + $0x48] sm:$0xf0] %v470_v40  ;;  %446 = vst [vmem:[#allocation2 + $0x48] sm:$0xf] %v441_v41  ;;  %772 = vrot.lane.b32.xlu1 %v771_v33, %s1518_s17  ;;  %742 = vrot.lane.b32.xlu0 %v740_v35, %s1517_s16  ;;  %v1526_v14 = vmov 0.0  }
  0xb4   : > { %1101 = vmatprep.mubr.f32.mxu0 %v1526_v14  ;;  %1360 = vmatprep.mubr.msk.f32.mxu1 %vm1020_vm13, %v1816_v12 }
  0xb5   : > { %1388 = vmatprep.subr.bf16.mxu1 %v1387_v42  ;;  %v497_v45 = vpop.permute.xlu1 %496  ;;  %v1780_v46 = vpop.permute.xlu0 %494 }
  0xb6   : > { %1390 = vmatpush3.bf16.msra.mxu1 %v1387_v42  ;;  %507 = vst.msk [vmem:[#allocation2 + $0x70] sm:$0xf] %vm506_vm1, %v497_v45  ;;  %v500_v47 = vsel %vm498_vm2, %v1780_v46, %v497_v45  ;;  %v987_v51 = vld [vmem:[#allocation2 + $0x30] sm:$0xff]  ;;  %vm643_vm1 = vcmask 695296  }
  0xb7   : > { %505 = vst [vmem:[#allocation2 + $0x68] sm:$0xf] %v500_v47  ;;  %830 = vrot.lane.b32.xlu1 %v829_v43, %s1520_s20  ;;  %800 = vrot.lane.b32.xlu0 %v798_v44, %s1519_s18 }
  0xb9   : > { %v526_v48 = vpop.permute.xlu1 %525  ;;  %v1786_v49 = vpop.permute.xlu0 %523 }
  0xba   : > { %536 = vst.msk [vmem:[#allocation2 + $0x70] sm:$0xf0] %vm535_vm3, %v526_v48  ;;  %v529_v50 = vsel %vm527_vm4, %v1786_v49, %v526_v48  ;;  %v990_v52 = vld [vmem:[#allocation2 + $0x48] sm:$0xff]  ;;  %vm672_vm3 = vcmask 687104  }
  0xbb   : > { %534 = vst [vmem:[#allocation2 + $0x68] sm:$0xf0] %v529_v50  ;;  %869 = vrot.lane.b32.xlu1 %v1594_v5, %s1522_s22  ;;  %840 = vrot.lane.b32.xlu0 %v1575_v1, %s1521_s21  ;;  %v1369_v53 = vpack.c.bf16 %v990_v52, %v987_v51 }
  0xbd   : > { %v555_v55 = vpop.permute.xlu1 %554  ;;  %v1795_v56 = vpop.permute.xlu0 %552  ;;  %1370 = vmatpush1.bf16.msra.mxu0 %v1369_v53 }
  0xbe   : > { %565 = vst.msk [vmem:[#allocation2 + $0x88] sm:$0xf] %vm564_vm5, %v555_v55  ;;  %v558_v57 = vsel %vm556_vm6, %v1795_v56, %v555_v55  ;;  %vm701_vm5 = vcmask 556032  }
  0xbf   : > { %563 = vst [vmem:[#allocation2 + $0x80] sm:$0xf] %v558_v57  ;;  %927 = vrot.lane.b32.xlu1 %v1594_v5, %s1524_s24  ;;  %898 = vrot.lane.b32.xlu0 %v1575_v1, %s1523_s23  ;;  %v945_v5 = vrot.slane %v943_v60, 4 }
  0xc1   : > { %v584_v61 = vpop.permute.xlu1 %583  ;;  %v582_v62 = vpop.permute.xlu0 %581 }
  0xc2   : > { %594 = vst.msk [vmem:[#allocation2 + $0x88] sm:$0xf0] %vm593_vm7, %v584_v61  ;;  %v587_v63 = vsel %vm585_vm8, %v582_v62, %v584_v61  ;;  %v994_v9 = vld [vmem:[#allocation2 + $0x68] sm:$0xff]  ;;  %vm513_vm7 = vcmask 1044296  }
  0xc3   : > { %592 = vst [vmem:[#allocation2 + $0x80] sm:$0xf0] %v587_v63  ;;  %888 = vrot.lane.b32.xlu1 %v887_v58, %s1522_s22  ;;  %858 = vrot.lane.b32.xlu0 %v856_v59, %s1521_s21 }
  0xc5   : > { %v425_v3 = vpop.permute.xlu1 %424  ;;  %v395_v4 = vpop.permute.xlu0 %394 }
  0xc6   : > { %428 = vst.msk [vmem:[#allocation2 + $0x40] sm:$0xf0] %vm427_vm9, %v425_v3  ;;  %vm571_vm9 = vcmask 1044160  }
  0xc7   : > { %398 = vst.msk [vmem:[#allocation2 + $0x40] sm:$0xf] %vm397_vm10, %v395_v4  ;;  %946 = vrot.lane.b32.xlu1 %v945_v5, %s1524_s24  ;;  %916 = vrot.lane.b32.xlu0 %v914_v0, %s1523_s23  ;;  %vm738_vm10 = vcmask 543744  }
  0xc9   : > { %v483_v7 = vpop.permute.xlu1 %482  ;;  %v453_v8 = vpop.permute.xlu0 %452 }
  0xca   : > { %486 = vst.msk [vmem:[#allocation2 + $0x58] sm:$0xf0] %vm485_vm11, %v483_v7  ;;  %v997_v10 = vld [vmem:[#allocation2 + $0x80] sm:$0xff]  ;;  %vm730_vm11 = vcmask 547840  }
  0xcb   : > { %456 = vst.msk [vmem:[#allocation2 + $0x58] sm:$0xf] %vm455_vm12, %v453_v8  ;;  %960 = vrot.lane.b32.xlu1 %v952_v6, %s1525_s25  ;;  %958 = vrot.lane.b32.xlu0 %v1582_v2, %s1525_s25  ;;  %v1371_v11 = vpack.c.bf16 %v997_v10, %v994_v9  ;;  %vm767_vm12 = vcmask 539652  }
  0xcd   : > { %v522_v15 = vpop.permute.xlu1 %521  ;;  %v493_v16 = vpop.permute.xlu0 %492  ;;  %1372 = vmatprep.subr.bf16.mxu0 %v1371_v11 }
  0xce   : > { %v528_v2 = vsel %vm527_vm4, %v522_v15, %v1786_v49  ;;  %v499_v17 = vsel %vm498_vm2, %v493_v16, %v1780_v46  ;;  %v989_v20 = vld [vmem:[#allocation2 + $0x40] sm:$0xff]  ;;  %vm680_vm2 = vcmask 683008   ;;  %vm709_vm4 = vcmask 556036  }
  0xcf   : > { %533 = vst [vmem:[#allocation2 + $0x60] sm:$0xf0] %v528_v2  ;;  %504 = vst [vmem:[#allocation2 + $0x60] sm:$0xf] %v499_v17  ;;  %956 = vrot.lane.b32.xlu0 %v1575_v1, %s1525_s25  ;;  %974 = vrot.lane.b32.xlu1 %v972_v13, %s1525_s25 }
  0xd1   : > { %v580_v18 = vpop.permute.xlu1 %579  ;;  %v551_v19 = vpop.permute.xlu0 %550 }
  0xd2   : > { %v992_v21 = vld [vmem:[#allocation2 + $0x58] sm:$0xff]  ;;  %v586_v22 = vsel %vm585_vm8, %v580_v18, %v582_v62  ;;  %v557_v23 = vsel %vm556_vm6, %v551_v19, %v1795_v56  ;;  %vm543_vm6 = vcmask 1048388   ;;  %vm601_vm8 = vcmask 1048252  }
  0xd3   : > { %v1391_v24 = vpack.c.bf16 %v992_v21, %v989_v20  ;;  %591 = vst [vmem:[#allocation2 + $0x78] sm:$0xf0] %v586_v22  ;;  %562 = vst [vmem:[#allocation2 + $0x78] sm:$0xf] %v557_v23 }
  0xd5   : > { %1392 = vmatprep.subr.bf16.mxu1 %v1391_v24  ;;  %v613_v25 = vpop.permute.xlu1 %612  ;;  %v611_v26 = vpop.permute.xlu0 %610 }
  0xd6   : > { %1394 = vmatpush3.bf16.msra.mxu1 %v1391_v24  ;;  %623 = vst.msk [vmem:[#allocation2 + $0xa0] sm:$0xf] %vm622_vm14, %v613_v25  ;;  %v616_v1 = vsel %vm614_vm15, %v611_v26, %v613_v25  ;;  %v993_v30 = vld [vmem:[#allocation2 + $0x60] sm:$0xff]  ;;  %vm759_vm14 = vcmask 539648  }
  0xd7   : > { %621 = vst [vmem:[#allocation2 + $0x98] sm:$0xf] %v616_v1 }
  0xd9   : > { %v642_v27 = vpop.permute.xlu1 %641  ;;  %v640_v28 = vpop.permute.xlu0 %639 }
  0xda   : > { %652 = vst.msk [vmem:[#allocation2 + $0xa0] sm:$0xf0] %vm651_vm0, %v642_v27  ;;  %v645_v29 = vsel %vm643_vm1, %v640_v28, %v642_v27  ;;  %v996_v31 = vld [vmem:[#allocation2 + $0x78] sm:$0xff]  ;;  %vm788_vm0 = vcmask 531456  }
  0xdb   : > { %650 = vst [vmem:[#allocation2 + $0x98] sm:$0xf0] %v645_v29  ;;  %v1373_v32 = vpack.c.bf16 %v996_v31, %v993_v30 }
  0xdd   : > { %v671_v33 = vpop.permute.xlu1 %670  ;;  %v669_v34 = vpop.permute.xlu0 %668  ;;  %1374 = vmatpush1.bf16.msra.mxu0 %v1373_v32 }
  0xde   : > { %681 = vst.msk [vmem:[#allocation2 + $0xb8] sm:$0xf] %vm680_vm2, %v671_v33  ;;  %v674_v35 = vsel %vm672_vm3, %v669_v34, %v671_v33  ;;  %vm817_vm2 = vcmask 523264  }
  0xdf   : > { %679 = vst [vmem:[#allocation2 + $0xb0] sm:$0xf] %v674_v35 }
  0xe1   : > { %v700_v36 = vpop.permute.xlu1 %699  ;;  %v698_v37 = vpop.permute.xlu0 %697 }
  0xe2   : > { %710 = vst.msk [vmem:[#allocation2 + $0xb8] sm:$0xf0] %vm709_vm4, %v700_v36  ;;  %v703_v38 = vsel %vm701_vm5, %v698_v37, %v700_v36  ;;  %v1000_v43 = vld [vmem:[#allocation2 + $0x98] sm:$0xff]  ;;  %vm629_vm4 = vcmask 1044144  }
  0xe3   : > { %708 = vst [vmem:[#allocation2 + $0xb0] sm:$0xf0] %v703_v38 }
  0xe5   : > { %v541_v39 = vpop.permute.xlu1 %540  ;;  %v511_v40 = vpop.permute.xlu0 %510 }
  0xe6   : > { %544 = vst.msk [vmem:[#allocation2 + $0x70] sm:$0xf0] %vm543_vm6, %v541_v39  ;;  %vm687_vm6 = vcmask 1044128  }
  0xe7   : > { %514 = vst.msk [vmem:[#allocation2 + $0x70] sm:$0xf] %vm513_vm7, %v511_v40  ;;  %vm854_vm7 = vcmask 388096  }
  0xe9   : > { %v599_v41 = vpop.permute.xlu1 %598  ;;  %v569_v42 = vpop.permute.xlu0 %568 }
  0xea   : > { %602 = vst.msk [vmem:[#allocation2 + $0x88] sm:$0xf0] %vm601_vm8, %v599_v41  ;;  %v1003_v44 = vld [vmem:[#allocation2 + $0xb0] sm:$0xff]  ;;  %vm846_vm8 = vcmask 392192  }
  0xeb   : > { %572 = vst.msk [vmem:[#allocation2 + $0x88] sm:$0xf] %vm571_vm9, %v569_v42  ;;  %v1375_v45 = vpack.c.bf16 %v1003_v44, %v1000_v43  ;;  %vm883_vm9 = vcmask 384004  }
  0xed   : > { %v638_v46 = vpop.permute.xlu1 %637  ;;  %v609_v47 = vpop.permute.xlu0 %608  ;;  %1376 = vmatprep.subr.bf16.mxu0 %v1375_v45 }
  0xee   : > { %v644_v48 = vsel %vm643_vm1, %v638_v46, %v640_v28  ;;  %v615_v49 = vsel %vm614_vm15, %v609_v47, %v611_v26  ;;  %v995_v52 = vld [vmem:[#allocation2 + $0x70] sm:$0xff]  ;;  %vm796_vm15 = vcmask 527360   ;;  %vm825_vm1 = vcmask 523268  }
  0xef   : > { %649 = vst [vmem:[#allocation2 + $0x90] sm:$0xf0] %v644_v48  ;;  %620 = vst [vmem:[#allocation2 + $0x90] sm:$0xf] %v615_v49 }
  0xf1   : > { %v696_v50 = vpop.permute.xlu1 %695  ;;  %v667_v51 = vpop.permute.xlu0 %666 }
  0xf2   : > { %v998_v53 = vld [vmem:[#allocation2 + $0x88] sm:$0xff]  ;;  %v702_v54 = vsel %vm701_vm5, %v696_v50, %v698_v37  ;;  %v673_v55 = vsel %vm672_vm3, %v667_v51, %v669_v34  ;;  %vm659_vm3 = vcmask 1048236   ;;  %vm717_vm5 = vcmask 1048100  }
  0xf3   : > { %v1395_v56 = vpack.c.bf16 %v998_v53, %v995_v52  ;;  %707 = vst [vmem:[#allocation2 + $0xa8] sm:$0xf0] %v702_v54  ;;  %678 = vst [vmem:[#allocation2 + $0xa8] sm:$0xf] %v673_v55 }
  0xf5   : > { %1396 = vmatprep.subr.bf16.mxu1 %v1395_v56  ;;  %v729_v57 = vpop.permute.xlu1 %728  ;;  %v727_v58 = vpop.permute.xlu0 %726 }
  0xf6   : > { %1398 = vmatpush3.bf16.msra.mxu1 %v1395_v56  ;;  %739 = vst.msk [vmem:[#allocation2 + $0xd0] sm:$0xf] %vm738_vm10, %v729_v57  ;;  %v732_v59 = vsel %vm730_vm11, %v727_v58, %v729_v57  ;;  %v999_v63 = vld [vmem:[#allocation2 + $0x90] sm:$0xff]  ;;  %vm875_vm10 = vcmask 384000  }
  0xf7   : > { %737 = vst [vmem:[#allocation2 + $0xc8] sm:$0xf] %v732_v59 }
  0xf9   : > { %v758_v60 = vpop.permute.xlu1 %757  ;;  %v756_v61 = vpop.permute.xlu0 %755 }
  0xfa   : > { %768 = vst.msk [vmem:[#allocation2 + $0xd0] sm:$0xf0] %vm767_vm12, %v758_v60  ;;  %v761_v62 = vsel %vm759_vm14, %v756_v61, %v758_v60  ;;  %v1002_v5 = vld [vmem:[#allocation2 + $0xa8] sm:$0xff]  ;;  %vm904_vm12 = vcmask 375808  }
  0xfb   : > { %766 = vst [vmem:[#allocation2 + $0xc8] sm:$0xf0] %v761_v62  ;;  %v1377_v0 = vpack.c.bf16 %v1002_v5, %v999_v63 }
  0xfd   : > { %v787_v3 = vpop.permute.xlu1 %786  ;;  %v785_v4 = vpop.permute.xlu0 %784  ;;  %1378 = vmatpush1.bf16.msra.mxu0 %v1377_v0 }
  0xfe   : > { %797 = vst.msk [vmem:[#allocation2 + $0xe8] sm:$0xf] %vm796_vm15, %v787_v3  ;;  %v790_v6 = vsel %vm788_vm0, %v785_v4, %v787_v3  ;;  %vm933_vm15 = vcmask 367616  }
  0xff   : > { %795 = vst [vmem:[#allocation2 + $0xe0] sm:$0xf] %v790_v6 }
 0x101   : > { %v816_v7 = vpop.permute.xlu1 %815  ;;  %v814_v8 = vpop.permute.xlu0 %813 }
 0x102   : > { %826 = vst.msk [vmem:[#allocation2 + $0xe8] sm:$0xf0] %vm825_vm1, %v816_v7  ;;  %v819_v9 = vsel %vm817_vm2, %v814_v8, %v816_v7  ;;  %v1006_v16 = vld [vmem:[#allocation2 + $0xc8] sm:$0xff]  ;;  %vm745_vm1 = vcmask 1043992  }
 0x103   : > { %824 = vst [vmem:[#allocation2 + $0xe0] sm:$0xf0] %v819_v9 }
 0x105   : > { %v657_v10 = vpop.permute.xlu1 %656  ;;  %v627_v11 = vpop.permute.xlu0 %626 }
 0x106   : > { %660 = vst.msk [vmem:[#allocation2 + $0xa0] sm:$0xf0] %vm659_vm3, %v657_v10  ;;  %vm803_vm3 = vcmask 1043976  }
 0x107   : > { %630 = vst.msk [vmem:[#allocation2 + $0xa0] sm:$0xf] %vm629_vm4, %v627_v11  ;;  %vm891_vm4 = vcmask 1047932  }
 0x109   : > { %v715_v13 = vpop.permute.xlu1 %714  ;;  %v685_v15 = vpop.permute.xlu0 %684 }
 0x10a   : > { %718 = vst.msk [vmem:[#allocation2 + $0xb8] sm:$0xf0] %vm717_vm5, %v715_v13  ;;  %v1009_v2 = vld [vmem:[#allocation2 + $0xe0] sm:$0xff]  ;;  %vm861_vm5 = vcmask 1043840  }
 0x10b   : > { %688 = vst.msk [vmem:[#allocation2 + $0xb8] sm:$0xf] %vm687_vm6, %v685_v15  ;;  %v1379_v17 = vpack.c.bf16 %v1009_v2, %v1006_v16  ;;  %vm949_vm6 = vcmask 1047916  }
 0x10d   : > { %v754_v18 = vpop.permute.xlu1 %753  ;;  %v725_v19 = vpop.permute.xlu0 %724  ;;  %1380 = vmatprep.subr.bf16.mxu0 %v1379_v17 }
 0x10e   : > { %v760_v20 = vsel %vm759_vm14, %v754_v18, %v756_v61  ;;  %v731_v21 = vsel %vm730_vm11, %v725_v19, %v727_v58  ;;  %v1001_v24 = vld [vmem:[#allocation2 + $0xa0] sm:$0xff]  ;;  %vm912_vm11 = vcmask 371712   ;;  %vm941_vm14 = vcmask 367620   ;;  %v980_v18 = vld [vmem:[%s1877_s2 + $0x8] sm:$0xf] }
 0x10f   : > { %765 = vst [vmem:[#allocation2 + $0xc0] sm:$0xf0] %v760_v20  ;;  %736 = vst [vmem:[#allocation2 + $0xc0] sm:$0xf] %v731_v21 }
 0x111   : > { %v812_v22 = vpop.permute.xlu1 %811  ;;  %v783_v23 = vpop.permute.xlu0 %782 }
 0x112   : > { %v1004_v25 = vld [vmem:[#allocation2 + $0xb8] sm:$0xff]  ;;  %v818_v26 = vsel %vm817_vm2, %v812_v22, %v814_v8  ;;  %v789_v1 = vsel %vm788_vm0, %v783_v23, %v785_v4  ;;  %vm775_vm0 = vcmask 1048084   ;;  %vm833_vm2 = vcmask 1048068  }
 0x113   : > { %v1399_v27 = vpack.c.bf16 %v1004_v25, %v1001_v24  ;;  %823 = vst [vmem:[#allocation2 + $0xd8] sm:$0xf0] %v818_v26  ;;  %794 = vst [vmem:[#allocation2 + $0xd8] sm:$0xf] %v789_v1 }
 0x115   : > { %1400 = vmatprep.subr.bf16.mxu1 %v1399_v27  ;;  %v845_v28 = vpop.permute.xlu1 %844  ;;  %v843_v29 = vpop.permute.xlu0 %842 }
 0x116   : > { %1402 = vmatpush3.bf16.msra.mxu1 %v1399_v27  ;;  %855 = vst.msk [vmem:[#allocation2 + $0x100] sm:$0xf] %vm854_vm7, %v845_v28  ;;  %v848_v30 = vsel %vm846_vm8, %v843_v29, %v845_v28  ;;  %v1005_v34 = vld [vmem:[#allocation2 + $0xc0] sm:$0xff]  ;;  %vm919_vm7 = vcmask 1043824  }
 0x117   : > { %853 = vst [vmem:[#allocation2 + $0xf8] sm:$0xf] %v848_v30 }
 0x119   : > { %v874_v31 = vpop.permute.xlu1 %873  ;;  %v872_v32 = vpop.permute.xlu0 %871 }
 0x11a   : > { %884 = vst.msk [vmem:[#allocation2 + $0x100] sm:$0xf0] %vm883_vm9, %v874_v31  ;;  %v877_v33 = vsel %vm875_vm10, %v872_v32, %v874_v31  ;;  %v1008_v35 = vld [vmem:[#allocation2 + $0xd8] sm:$0xff]  ;;  %vm962_vm9 = vcmask 359424  }
 0x11b   : > { %882 = vst [vmem:[#allocation2 + $0xf8] sm:$0xf0] %v877_v33  ;;  %v1381_v36 = vpack.c.bf16 %v1008_v35, %v1005_v34 }
 0x11d   : > { %v903_v37 = vpop.permute.xlu1 %902  ;;  %v901_v38 = vpop.permute.xlu0 %900  ;;  %1382 = vmatpush1.bf16.msra.mxu0 %v1381_v36 }
 0x11e   : > { %913 = vst.msk [vmem:[#allocation2 + $0x118] sm:$0xf] %vm912_vm11, %v903_v37  ;;  %v906_v39 = vsel %vm904_vm12, %v901_v38, %v903_v37  ;;  %vm1027_vm11 = vcmask 1043456  }
 0x11f   : > { %911 = vst [vmem:[#allocation2 + $0x110] sm:$0xf] %v906_v39 }
 0x121   : > { %v932_v40 = vpop.permute.xlu1 %931  ;;  %v930_v41 = vpop.permute.xlu0 %929 }
 0x122   : > { %942 = vst.msk [vmem:[#allocation2 + $0x118] sm:$0xf0] %vm941_vm14, %v932_v40  ;;  %v935_v42 = vsel %vm933_vm15, %v930_v41, %v932_v40  ;;  %v1012_v47 = vld [vmem:[#allocation2 + $0xf8] sm:$0xff] }
 0x123   : > { %940 = vst [vmem:[#allocation2 + $0x110] sm:$0xf0] %v935_v42 }
 0x125   : > { %v773_v43 = vpop.permute.xlu1 %772  ;;  %v743_v44 = vpop.permute.xlu0 %742 }
 0x126   : > { %776 = vst.msk [vmem:[#allocation2 + $0xd0] sm:$0xf0] %vm775_vm0, %v773_v43 }
 0x127   : > { %746 = vst.msk [vmem:[#allocation2 + $0xd0] sm:$0xf] %vm745_vm1, %v743_v44 }
 0x129   : > { %v831_v45 = vpop.permute.xlu1 %830  ;;  %v801_v46 = vpop.permute.xlu0 %800 }
 0x12a   : > { %834 = vst.msk [vmem:[#allocation2 + $0xe8] sm:$0xf0] %vm833_vm2, %v831_v45  ;;  %v1015_v48 = vld [vmem:[#allocation2 + $0x110] sm:$0xff] }
 0x12b   : > { %804 = vst.msk [vmem:[#allocation2 + $0xe8] sm:$0xf] %vm803_vm3, %v801_v46  ;;  %v1383_v49 = vpack.c.bf16 %v1015_v48, %v1012_v47 }
 0x12d   : > { %v870_v50 = vpop.permute.xlu1 %869  ;;  %v841_v51 = vpop.permute.xlu0 %840  ;;  %1384 = vmatprep.subr.bf16.mxu0 %v1383_v49 }
 0x12e   : > { %v876_v52 = vsel %vm875_vm10, %v870_v50, %v872_v32  ;;  %v847_v53 = vsel %vm846_vm8, %v841_v51, %v843_v29  ;;  %v1007_v56 = vld [vmem:[#allocation2 + $0xd0] sm:$0xff]  ;;  %vm970_vm8 = vcmask 355328   ;;  %vm977_vm10 = vcmask 1043808  }
 0x12f   : > { %881 = vst [vmem:[#allocation2 + $0xf0] sm:$0xf0] %v876_v52  ;;  %852 = vst [vmem:[#allocation2 + $0xf0] sm:$0xf] %v847_v53 }
 0x131   : > { %v928_v54 = vpop.permute.xlu1 %927  ;;  %v899_v55 = vpop.permute.xlu0 %898 }
 0x132   : > { %v1010_v57 = vld [vmem:[#allocation2 + $0xe8] sm:$0xff]  ;;  %v934_v58 = vsel %vm933_vm15, %v928_v54, %v930_v41  ;;  %v905_v59 = vsel %vm904_vm12, %v899_v55, %v901_v38 }
 0x133   : > { %v1403_v60 = vpack.c.bf16 %v1010_v57, %v1007_v56  ;;  %939 = vst [vmem:[#allocation2 + $0x108] sm:$0xf0] %v934_v58  ;;  %910 = vst [vmem:[#allocation2 + $0x108] sm:$0xf] %v905_v59 }
 0x135   : > { %1404 = vmatprep.subr.bf16.mxu1 %v1403_v60  ;;  %v889_v61 = vpop.permute.xlu1 %888  ;;  %v859_v62 = vpop.permute.xlu0 %858 }
 0x136   : > { %1406 = vmatpush3.bf16.msra.mxu1 %v1403_v60  ;;  %892 = vst.msk [vmem:[#allocation2 + $0x100] sm:$0xf0] %vm891_vm4, %v889_v61  ;;  %v1011_v0 = vld [vmem:[#allocation2 + $0xf0] sm:$0xff] }
 0x137   : > { %862 = vst.msk [vmem:[#allocation2 + $0x100] sm:$0xf] %vm861_vm5, %v859_v62 }
 0x139   : > { %v947_v63 = vpop.permute.xlu1 %946  ;;  %v917_v5 = vpop.permute.xlu0 %916 }
 0x13a   : > { %950 = vst.msk [vmem:[#allocation2 + $0x118] sm:$0xf0] %vm949_vm6, %v947_v63  ;;  %v1014_v3 = vld [vmem:[#allocation2 + $0x108] sm:$0xff] }
 0x13b   : > { %920 = vst.msk [vmem:[#allocation2 + $0x118] sm:$0xf] %vm919_vm7, %v917_v5  ;;  %v1385_v4 = vpack.c.bf16 %v1014_v3, %v1011_v0 }
 0x13d   : > { %v961_v6 = vpop.permute.xlu1 %960  ;;  %v959_v7 = vpop.permute.xlu0 %958  ;;  %1386 = vmatpush1.bf16.msra.mxu0 %v1385_v4 }
 0x13e   : > { %971 = vst.msk [vmem:[#allocation2 + $0x130] sm:$0xf] %vm970_vm8, %v961_v6  ;;  %v964_v8 = vsel %vm962_vm9, %v959_v7, %v961_v6  ;;  %v1013_v11 = vld [vmem:[#allocation2 + $0x100] sm:$0xff] }
 0x13f   : > { %969 = vst [vmem:[#allocation2 + $0x128] sm:$0xf] %v964_v8 }
 0x141   : > { %v957_v9 = vpop.permute.xlu0 %956  ;;  %v975_v10 = vpop.permute.xlu1 %974 }
 0x142   : > { %v1016_v13 = vld [vmem:[#allocation2 + $0x118] sm:$0xff]  ;;  %v963_v15 = vsel %vm962_vm9, %v957_v9, %v959_v7  ;;  %978 = vst.msk [vmem:[#allocation2 + $0x130] sm:$0xf] %vm977_vm10, %v975_v10 }
 0x143   : > { %v1407_v16 = vpack.c.bf16 %v1016_v13, %v1013_v11  ;;  %968 = vst [vmem:[#allocation2 + $0x120] sm:$0xf] %v963_v15 }
 0x145   : > { %1408 = vmatprep.subr.bf16.mxu1 %v1407_v16 }
 0x146   : > { %1410 = vmatpush3.bf16.msra.mxu1 %v1407_v16  ;;  %v1018_v2 = vld [vmem:[#allocation2 + $0x128] sm:$0xf] }
 0x147   : > { %1308 = vmatprep.subr.msk.mxu0 %vm1027_vm11, %v1018_v2 }
 0x149   : > { %v1019_v17 = vld [vmem:[#allocation2 + $0x130] sm:$0xf] }
 0x14a   : > { %v1017_v19 = vld [vmem:[#allocation2 + $0x120] sm:$0xf]  ;;  %1358 = vmatprep.subr.msk.mxu1 %vm1027_vm11, %v1019_v17 }
 0x14b   : > { %1309 = vmatpush1.msk.msra.mxu0 %vm1027_vm11, %v1017_v19  ;;  %1359 = vmatpush3.msk.msra.mxu1 %vm1027_vm11, %v1019_v17 }
 0x14c   : > { %1310 = vmatmul.mubr.msk.f32.vlgmr.msra.gmra.mrb[0].mxu0 %vm1020_vm13, %v1816_v12  ;;  %1361 = vmatmul.mubr.msk.f32.vlgmr.msra.gmra.mrb[0].mxu1 %vm1020_vm13, %v980_v18 }
 0x14d   : > { %1107 = vmatprep.mubr.f32.mxu0 %v1526_v14 }
 0x150   : > { %1311 = vmatmul.mubr.msk.f32.gmra.mrb[2].mxu0 %vm1020_vm13, %v980_v18 }
 0x21f   : > { %v1103_v20 = vpop.f32.mrb[0].mxu0  ;;  %v1362_v21 = vpop.f32.mrb[0].mxu1 }
 0x220   : > { %1189 = vst [vmem:[%s273_s5] sm:$0xff] %v1103_v20  ;;  %v1105_v22 = vpop.f32.mrb[1].mxu0  ;;  %1194 = vst [vmem:[%s273_s5 + $0x28] sm:$0xf] %v1362_v21  ;;  %v1180_v23 = vpop.f32.mrb[1].mxu1 }
 0x221   : > { %1190 = vst [vmem:[%s273_s5 + $0x8] sm:$0xff] %v1105_v22  ;;  %1191 = vst [vmem:[%s273_s5 + $0x10] sm:$0xff] %v1180_v23 }
 0x223   : > { %v1109_v12 = vpop.f32.mrb[2].mxu0 }
 0x224   : > { %1192 = vst [vmem:[%s273_s5 + $0x18] sm:$0xf] %v1109_v12  ;;  %v1111_v24 = vpop.f32.mrb[3].mxu0 }
 0x225   : > { %1193 = vst [vmem:[%s273_s5 + $0x20] sm:$0xf] %v1111_v24 }
 0x226 PF: > { %s13_s14 = sadd.s32 1, %s1500_s14   ;;  %s1879_s12 = smov %s1496_s13 }
 0x227   : > { %p10_p5 = scmp.ge.s32.totalorder %s13_s14, 4   ;;  %s1880_s13 = smov %s1882_s15 }
 0x229   :  { %12 = sbr.rel (!%p10_p5) target bundleno = 2 (0x2), region = 65 }

</bundles_post_ra>
